<compile_context>
chip_gen: v7x
topology: tpu7x:2x2x1
jax: 0.10.0
libtpu: 0.0.40
codegen_flags: <defaults>
</compile_context>

<pallas_src>
import functools

import numpy as np
import jax
import jax.numpy as jnp
from jax.experimental import pallas as pl
from jax.experimental.pallas import tpu as pltpu

LANES = 128


def _ceil128(n):
    return ((n + 127) // 128) * 128


# ----------------------------------------------------------------------------
# Parameter init (PyTorch-default-style uniform, deterministic)
# ----------------------------------------------------------------------------
def _uniform(key, shape, fan_in):
    bound = 1.0 / np.sqrt(float(fan_in))
    return jax.random.uniform(key, shape, jnp.float32, -bound, bound)


def init_params(key, H, W):
    flat = 64 * (H // 8) * (W // 8)
    keys = jax.random.split(key, 20)
    p = {}
    conv_dims = [(3, 16), (16, 32), (32, 64)]          # Conv2d weight (Cout,Cin,4,4)
    for i, (ci, co) in enumerate(conv_dims):
        fan = ci * 16
        p[f"ec{i+1}_w"] = _uniform(keys[2 * i], (co, ci, 4, 4), fan)
        p[f"ec{i+1}_b"] = _uniform(keys[2 * i + 1], (co,), fan)
    fc_dims = [("efc1", flat, 64), ("efc2", 64, 32),
               ("dfc1", 32, 64), ("dfc2", 64, flat)]   # Linear weight (out,in)
    for j, (name, fi, fo) in enumerate(fc_dims):
        p[f"{name}_w"] = _uniform(keys[6 + 2 * j], (fo, fi), fi)
        p[f"{name}_b"] = _uniform(keys[6 + 2 * j + 1], (fo,), fi)
    dec_dims = [(64, 32), (32, 16), (16, 3)]           # ConvT weight (Cin,Cout,4,4)
    for i, (ci, co) in enumerate(dec_dims):
        fan = ci * 16
        p[f"dc{i+1}_w"] = _uniform(keys[14 + 2 * i], (ci, co, 4, 4), fan)
        p[f"dc{i+1}_b"] = _uniform(keys[14 + 2 * i + 1], (co,), fan)
    return p


# ----------------------------------------------------------------------------
# One-time weight packing
# ----------------------------------------------------------------------------
def _conv_w_blocks(weight, w_in):
    """Conv2d(k=4,s=2,p=1) per-kh width operator: (4, w_in*Cin, (w_in//2)*Cout)."""
    cout, cin = weight.shape[0], weight.shape[1]
    w_out = w_in // 2
    sel = np.zeros((4, w_in, w_out), np.float32)       # sel[kw,w,wo]=[w==2wo+kw-1]
    for kw in range(4):
        for wo in range(w_out):
            w = 2 * wo + kw - 1
            if 0 <= w < w_in:
                sel[kw, w, wo] = 1.0
    op = jnp.einsum("qwv,oihq->hwivo", jnp.asarray(sel), weight)
    return op.reshape(4, w_in * cin, w_out * cout)     # lanes: w*Cin+ci -> wo*Cout+co


def _deconv_w_blocks(weight, w_in):
    """ConvTranspose2d(k=4,s=2,p=1) per-kh width operator: (4, w_in*Cin, 2*w_in*Cout)."""
    cin, cout = weight.shape[0], weight.shape[1]
    w_out = 2 * w_in
    sel = np.zeros((4, w_in, w_out), np.float32)       # sel[kw,wi,wo]=[wo==2wi+kw-1]
    for kw in range(4):
        for wi in range(w_in):
            wo = 2 * wi + kw - 1
            if 0 <= wo < w_out:
                sel[kw, wi, wo] = 1.0
    op = jnp.einsum("qwv,iohq->hwivo", jnp.asarray(sel), weight)
    return op.reshape(4, w_in * cin, w_out * cout)


def _stack_k(op, l_in_pad=None, l_out_pad=None):
    """(nb, L_in, L_out) -> (nb*L_in_pad, L_out_pad): kh folded into contraction K."""
    nb, l_in, l_out = op.shape
    if l_out_pad is not None and l_out_pad > l_out:
        op = jnp.pad(op, ((0, 0), (0, 0), (0, l_out_pad - l_out)))
    if l_in_pad is not None and l_in_pad > l_in:
        op = jnp.pad(op, ((0, 0), (0, l_in_pad - l_in), (0, 0)))
    nb, l_in, l_out = op.shape
    return op.reshape(nb * l_in, l_out)


def _stack_n(op, l_in_pad=None, l_out_pad=None):
    """(nb, L_in, L_out) -> (L_in_pad, nb*L_out_pad): kh folded into output lanes N."""
    nb, l_in, l_out = op.shape
    if l_out_pad is not None and l_out_pad > l_out:
        op = jnp.pad(op, ((0, 0), (0, 0), (0, l_out_pad - l_out)))
    if l_in_pad is not None and l_in_pad > l_in:
        op = jnp.pad(op, ((0, 0), (0, l_in_pad - l_in), (0, 0)))
    nb, l_in, l_out = op.shape
    return jnp.transpose(op, (1, 0, 2)).reshape(l_in, nb * l_out)


def _pad2(a, rows, cols):
    r, c = a.shape
    return jnp.pad(a, ((0, rows - r), (0, cols - c)))


# Block-diagonal (over the TB batch tile) 0/1 row selection operators.
def _sel_conv_gather(h_in, tb):
    h_out = h_in // 2
    r_in, r_out = tb * h_in, tb * h_out
    s = np.zeros((4 * r_out, r_in), np.float32)
    for kh in range(4):
        for b in range(tb):
            for oh in range(h_out):
                h = 2 * oh + kh - 1
                if 0 <= h < h_in:
                    s[kh * r_out + b * h_out + oh, b * h_in + h] = 1.0
    return s


def _sel_fc1_gather(h8, tb):
    r_in, r_out = tb * h8, tb
    s = np.zeros((h8 * r_out, r_in), np.float32)
    for h in range(h8):
        for b in range(tb):
            s[h * r_out + b, b * h8 + h] = 1.0
    return s


def _sel_deconv_scatter(h_in, tb):
    h_out = 2 * h_in
    r_in, r_out = tb * h_in, tb * h_out
    s = np.zeros((r_out, 4 * r_in), np.float32)
    for kh in range(4):
        for b in range(tb):
            for hi in range(h_in):
                ho = 2 * hi + kh - 1
                if 0 <= ho < h_out:
                    s[b * h_out + ho, kh * r_in + b * h_in + hi] = 1.0
    return s


def _sel_fc4_scatter(h8, tb):
    r_in, r_out = tb, tb * h8
    s = np.zeros((r_out, h8 * r_in), np.float32)
    for h in range(h8):
        for b in range(tb):
            s[b * h8 + h, h * r_in + b] = 1.0
    return s


def pack_params(params, H, W, tb):
    """Repack PyTorch-layout params into the fused kernel's VMEM operands."""
    assert H % 8 == 0 and W % 16 == 0, "hidden lane widths must be multiples of 128"
    bf16, f32 = jnp.bfloat16, jnp.float32
    H8, W8 = H // 8, W // 8
    lanes_io = _ceil128(W * 3)

    consts, cfg = [], []

    def add_gather(sel, m, bias, nb, relu):
        consts.extend([jnp.asarray(sel, bf16), m.astype(bf16), bias.astype(f32)])
        cfg.append(("gather", nb, relu))

    def add_scatter(m, sel, bias, nb, relu):
        consts.extend([m.astype(bf16), jnp.asarray(sel, bf16), bias.astype(f32)])
        cfg.append(("scatter", nb, relu))

    def add_dense(w, bias, relu):
        consts.extend([w.astype(bf16), bias.astype(f32)])
        cfg.append(("dense", 0, relu))

    # ---- encoder convs (gather form, kh folded into K) ----
    enc = [(H, W), (H // 2, W // 2), (H // 4, W // 4)]
    for i, (hi, wi) in enumerate(enc):
        wt, b = params[f"ec{i+1}_w"], params[f"ec{i+1}_b"]
        op = _conv_w_blocks(wt, wi)
        m = _stack_k(op, l_in_pad=(lanes_io if i == 0 else None))
        bias = jnp.tile(b, wi // 2).reshape(1, -1)
        add_gather(_sel_conv_gather(hi, tb), m, bias, 4, True)

    # ---- encoder FC (NCHW flatten folded into efc1, padded to 128 lanes) ----
    w1 = params["efc1_w"].reshape(64, 64, H8, W8)                    # (o, c, h, w)
    op1 = jnp.transpose(w1, (2, 3, 1, 0)).reshape(H8, W8 * 64, 64)   # (h, (w,c), o)
    m1 = _stack_k(op1, l_out_pad=LANES)
    b1 = jnp.pad(params["efc1_b"].reshape(1, -1), ((0, 0), (0, LANES - 64)))
    add_gather(_sel_fc1_gather(H8, tb), m1, b1, H8, True)

    w2 = _pad2(params["efc2_w"].T, LANES, LANES)
    b2 = jnp.pad(params["efc2_b"].reshape(1, -1), ((0, 0), (0, LANES - 32)))
    add_dense(w2, b2, False)

    # ---- decoder FC ----
    w3 = _pad2(params["dfc1_w"].T, LANES, LANES)
    b3 = jnp.pad(params["dfc1_b"].reshape(1, -1), ((0, 0), (0, LANES - 64)))
    add_dense(w3, b3, True)

    w4 = params["dfc2_w"].reshape(64, H8, W8, 64)                    # (c, h, w, j)
    op4 = jnp.transpose(w4, (1, 3, 2, 0)).reshape(H8, 64, W8 * 64)   # (h, j, (w,c))
    m4 = _stack_n(op4, l_in_pad=LANES)
    b4 = jnp.transpose(params["dfc2_b"].reshape(64, H8, W8),
                       (1, 2, 0)).reshape(H8, W8 * 64)               # (h, (w,c))
    b4 = jnp.tile(b4, (tb, 1))                                       # (tb*H8, (w,c))
    add_scatter(m4, _sel_fc4_scatter(H8, tb), b4, H8, True)

    # ---- decoder transposed convs (scatter form, kh folded into N) ----
    dec = [(H8, W8), (H // 4, W // 4), (H // 2, W // 2)]
    for i, (hi, wi) in enumerate(dec):
        wt, b = params[f"dc{i+1}_w"], params[f"dc{i+1}_b"]
        cout = wt.shape[1]
        op = _deconv_w_blocks(wt, wi)
        l_out = 2 * wi * cout
        l_out_pad = lanes_io if i == 2 else None
        m = _stack_n(op, l_out_pad=l_out_pad)
        bias = jnp.tile(b, 2 * wi).reshape(1, -1)
        if l_out_pad is not None and l_out_pad > l_out:
            bias = jnp.pad(bias, ((0, 0), (0, l_out_pad - l_out)))
        add_scatter(m, _sel_deconv_scatter(hi, tb), bias, 4, i != 2)  # no ReLU on last

    return consts, cfg


# ----------------------------------------------------------------------------
# The single fused Pallas kernel (one grid step == TB batch samples)
# ----------------------------------------------------------------------------
def _fused_kernel(cfg, x_ref, *refs):
    bf16, f32 = jnp.bfloat16, jnp.float32
    out_ref = refs[-1]
    cs = refs[:-1]

    def gather_layer(x, s_ref, m_ref, b_ref, nb, relu):
        # out = [G_0 | .. | G_{nb-1}] @ M_stackK + b   with G_k = S_k @ x (0/1 gather)
        g = jnp.dot(s_ref[...], x.astype(bf16),
                    preferred_element_type=f32).astype(bf16)        # exact row copies
        r_out = s_ref.shape[0] // nb
        gcat = jnp.concatenate(
            [g[k * r_out:(k + 1) * r_out, :] for k in range(nb)], axis=1)
        out = jnp.dot(gcat, m_ref[...], preferred_element_type=f32) + b_ref[...]
        return jnp.maximum(out, 0.0) if relu else out

    def scatter_layer(x, m_ref, s_ref, b_ref, nb, relu):
        # out = S @ rows_stack_k( x @ [M_0 | .. | M_{nb-1}] ) + b   (0/1 scatter-sum)
        y = jnp.dot(x.astype(bf16), m_ref[...], preferred_element_type=f32)
        l_out = m_ref.shape[1] // nb
        yr = jnp.concatenate(
            [y[:, k * l_out:(k + 1) * l_out] for k in range(nb)], axis=0).astype(bf16)
        out = jnp.dot(s_ref[...], yr, preferred_element_type=f32) + b_ref[...]
        return jnp.maximum(out, 0.0) if relu else out

    def dense_layer(x, w_ref, b_ref, relu):
        out = jnp.dot(x.astype(bf16), w_ref[...],
                      preferred_element_type=f32) + b_ref[...]
        return jnp.maximum(out, 0.0) if relu else out

    x = x_ref[...]
    i = 0
    for kind, nb, relu in cfg:                       # statically unrolled
        if kind == "gather":
            x = gather_layer(x, cs[i], cs[i + 1], cs[i + 2], nb, relu)
            i += 3
        elif kind == "scatter":
            x = scatter_layer(x, cs[i], cs[i + 1], cs[i + 2], nb, relu)
            i += 3
        else:
            x = dense_layer(x, cs[i], cs[i + 1], relu)
            i += 2
    out_ref[...] = x                                 # f32, lane-dense (padded to 128)


# ----------------------------------------------------------------------------
# Wrapper: boundary layout conversion + pallas_call
# ----------------------------------------------------------------------------
def autoencoder_forward(x_nchw, consts, cfg, tb):
    B, C, H, W = x_nchw.shape
    assert B % tb == 0
    lanes = _ceil128(W * C)

    x_slab = jnp.transpose(x_nchw, (0, 2, 3, 1)).reshape(B * H, W * C)
    x_slab = jnp.pad(x_slab, ((0, 0), (0, lanes - W * C))).astype(jnp.bfloat16)

    kernel = functools.partial(_fused_kernel, tuple(cfg))
    out_slab = pl.pallas_call(
        kernel,
        out_shape=jax.ShapeDtypeStruct((B * H, lanes), jnp.float32),
        grid=(B // tb,),
        in_specs=[pl.BlockSpec((tb * H, lanes), lambda b: (b, 0))]
                 + [pl.BlockSpec(c.shape, lambda b: (0, 0)) for c in consts],
        out_specs=pl.BlockSpec((tb * H, lanes), lambda b: (b, 0)),
        compiler_params=pltpu.CompilerParams(
            dimension_semantics=("parallel",),
            vmem_limit_bytes=32 * 1024 * 1024),
    )(x_slab, *consts)

    out = out_slab[:, :W * C].reshape(B, H, W, C)
    return jnp.transpose(out, (0, 3, 1, 2))


# ----------------------------------------------------------------------------
if __name__ == "__main__":
    B, C, H, W = 2, 3, 16, 16                 # small IMAGE_SHAPE = (3, 16, 16)
    TB = 2                                    # batch tile (samples per grid step)

    key = jax.random.PRNGKey(0)
    k_x, k_p = jax.random.split(key)
    x = jax.random.normal(k_x, (B, C, H, W), jnp.float32)

    params = init_params(k_p, H, W)
    consts, cfg = pack_params(params, H, W, TB)   # one-time weight packing

    fwd = jax.jit(functools.partial(autoencoder_forward, cfg=tuple(cfg), tb=TB))
    out = jax.block_until_ready(fwd(x, consts))

    assert out.shape == (B, C, H, W), out.shape
    assert out.dtype == jnp.float32
    assert bool(jnp.all(jnp.isfinite(out)))
    print("KERNEL_OK")
</pallas_src>

<mosaic_0001>
module attributes {stable_mosaic.version = 11 : i64} {
  func.func @_fused_kernel(%arg0: i32, %arg1: memref<32x128xbf16, #tpu.memory_space<vmem>>, %arg2: memref<64x32xbf16, #tpu.memory_space<vmem>>, %arg3: memref<512x128xbf16, #tpu.memory_space<vmem>>, %arg4: memref<1x128xf32, #tpu.memory_space<vmem>>, %arg5: memref<32x16xbf16, #tpu.memory_space<vmem>>, %arg6: memref<512x128xbf16, #tpu.memory_space<vmem>>, %arg7: memref<1x128xf32, #tpu.memory_space<vmem>>, %arg8: memref<16x8xbf16, #tpu.memory_space<vmem>>, %arg9: memref<512x128xbf16, #tpu.memory_space<vmem>>, %arg10: memref<1x128xf32, #tpu.memory_space<vmem>>, %arg11: memref<4x4xbf16, #tpu.memory_space<vmem>>, %arg12: memref<256x128xbf16, #tpu.memory_space<vmem>>, %arg13: memref<1x128xf32, #tpu.memory_space<vmem>>, %arg14: memref<128x128xbf16, #tpu.memory_space<vmem>>, %arg15: memref<1x128xf32, #tpu.memory_space<vmem>>, %arg16: memref<128x128xbf16, #tpu.memory_space<vmem>>, %arg17: memref<1x128xf32, #tpu.memory_space<vmem>>, %arg18: memref<128x256xbf16, #tpu.memory_space<vmem>>, %arg19: memref<4x4xbf16, #tpu.memory_space<vmem>>, %arg20: memref<4x128xf32, #tpu.memory_space<vmem>>, %arg21: memref<128x512xbf16, #tpu.memory_space<vmem>>, %arg22: memref<8x16xbf16, #tpu.memory_space<vmem>>, %arg23: memref<1x128xf32, #tpu.memory_space<vmem>>, %arg24: memref<128x512xbf16, #tpu.memory_space<vmem>>, %arg25: memref<16x32xbf16, #tpu.memory_space<vmem>>, %arg26: memref<1x128xf32, #tpu.memory_space<vmem>>, %arg27: memref<128x512xbf16, #tpu.memory_space<vmem>>, %arg28: memref<32x64xbf16, #tpu.memory_space<vmem>>, %arg29: memref<1x128xf32, #tpu.memory_space<vmem>>, %arg30: memref<32x128xf32, #tpu.memory_space<vmem>>) attributes {dimension_semantics = [#tpu.dimension_semantics<parallel>], iteration_bounds = array<i64: 1>, scalar_prefetch = 0 : i64, scratch_operands = 0 : i64, tpu.core_type = #tpu.core_type<tc>, window_params = [{transform_indices = @transform_0, window_bounds = array<i64: 32, 128>}, {pipeline_mode = #tpu.pipeline_mode<synchronous>, transform_indices = @transform_1, window_bounds = array<i64: 64, 32>}, {pipeline_mode = #tpu.pipeline_mode<synchronous>, transform_indices = @transform_2, window_bounds = array<i64: 512, 128>}, {pipeline_mode = #tpu.pipeline_mode<synchronous>, transform_indices = @transform_3, window_bounds = array<i64: 1, 128>}, {pipeline_mode = #tpu.pipeline_mode<synchronous>, transform_indices = @transform_4, window_bounds = array<i64: 32, 16>}, {pipeline_mode = #tpu.pipeline_mode<synchronous>, transform_indices = @transform_5, window_bounds = array<i64: 512, 128>}, {pipeline_mode = #tpu.pipeline_mode<synchronous>, transform_indices = @transform_6, window_bounds = array<i64: 1, 128>}, {pipeline_mode = #tpu.pipeline_mode<synchronous>, transform_indices = @transform_7, window_bounds = array<i64: 16, 8>}, {pipeline_mode = #tpu.pipeline_mode<synchronous>, transform_indices = @transform_8, window_bounds = array<i64: 512, 128>}, {pipeline_mode = #tpu.pipeline_mode<synchronous>, transform_indices = @transform_9, window_bounds = array<i64: 1, 128>}, {pipeline_mode = #tpu.pipeline_mode<synchronous>, transform_indices = @transform_10, window_bounds = array<i64: 4, 4>}, {pipeline_mode = #tpu.pipeline_mode<synchronous>, transform_indices = @transform_11, window_bounds = array<i64: 256, 128>}, {pipeline_mode = #tpu.pipeline_mode<synchronous>, transform_indices = @transform_12, window_bounds = array<i64: 1, 128>}, {pipeline_mode = #tpu.pipeline_mode<synchronous>, transform_indices = @transform_13, window_bounds = array<i64: 128, 128>}, {pipeline_mode = #tpu.pipeline_mode<synchronous>, transform_indices = @transform_14, window_bounds = array<i64: 1, 128>}, {pipeline_mode = #tpu.pipeline_mode<synchronous>, transform_indices = @transform_15, window_bounds = array<i64: 128, 128>}, {pipeline_mode = #tpu.pipeline_mode<synchronous>, transform_indices = @transform_16, window_bounds = array<i64: 1, 128>}, {pipeline_mode = #tpu.pipeline_mode<synchronous>, transform_indices = @transform_17, window_bounds = array<i64: 128, 256>}, {pipeline_mode = #tpu.pipeline_mode<synchronous>, transform_indices = @transform_18, window_bounds = array<i64: 4, 4>}, {pipeline_mode = #tpu.pipeline_mode<synchronous>, transform_indices = @transform_19, window_bounds = array<i64: 4, 128>}, {pipeline_mode = #tpu.pipeline_mode<synchronous>, transform_indices = @transform_20, window_bounds = array<i64: 128, 512>}, {pipeline_mode = #tpu.pipeline_mode<synchronous>, transform_indices = @transform_21, window_bounds = array<i64: 8, 16>}, {pipeline_mode = #tpu.pipeline_mode<synchronous>, transform_indices = @transform_22, window_bounds = array<i64: 1, 128>}, {pipeline_mode = #tpu.pipeline_mode<synchronous>, transform_indices = @transform_23, window_bounds = array<i64: 128, 512>}, {pipeline_mode = #tpu.pipeline_mode<synchronous>, transform_indices = @transform_24, window_bounds = array<i64: 16, 32>}, {pipeline_mode = #tpu.pipeline_mode<synchronous>, transform_indices = @transform_25, window_bounds = array<i64: 1, 128>}, {pipeline_mode = #tpu.pipeline_mode<synchronous>, transform_indices = @transform_26, window_bounds = array<i64: 128, 512>}, {pipeline_mode = #tpu.pipeline_mode<synchronous>, transform_indices = @transform_27, window_bounds = array<i64: 32, 64>}, {pipeline_mode = #tpu.pipeline_mode<synchronous>, transform_indices = @transform_28, window_bounds = array<i64: 1, 128>}, {transform_indices = @transform_29, window_bounds = array<i64: 32, 128>}]} {
    %c0 = arith.constant 0 : index
    %c0_0 = arith.constant 0 : index
    %0 = vector.load %arg1[%c0, %c0_0] : memref<32x128xbf16, #tpu.memory_space<vmem>>, vector<32x128xbf16>
    %c0_1 = arith.constant 0 : index
    %c0_2 = arith.constant 0 : index
    %1 = vector.load %arg2[%c0_1, %c0_2] : memref<64x32xbf16, #tpu.memory_space<vmem>>, vector<64x32xbf16>
    %cst = arith.constant dense<0.000000e+00> : vector<64x128xf32>
    %2 = tpu.matmul %1, %0, %cst {dimension_numbers = #tpu.dot_dimension_numbers<[1], [0], [0], [1], [0, 0, 1, 1], [], []>} : vector<64x32xbf16>, vector<32x128xbf16>, vector<64x128xf32> -> vector<64x128xf32>
    %3 = arith.truncf %2 : vector<64x128xf32> to vector<64x128xbf16>
    %4 = vector.extract_strided_slice %3 {offsets = [0, 0], sizes = [16, 128], strides = [1, 1]} : vector<64x128xbf16> to vector<16x128xbf16>
    %5 = vector.extract_strided_slice %3 {offsets = [16, 0], sizes = [16, 128], strides = [1, 1]} : vector<64x128xbf16> to vector<16x128xbf16>
    %6 = vector.extract_strided_slice %3 {offsets = [32, 0], sizes = [16, 128], strides = [1, 1]} : vector<64x128xbf16> to vector<16x128xbf16>
    %7 = vector.extract_strided_slice %3 {offsets = [48, 0], sizes = [16, 128], strides = [1, 1]} : vector<64x128xbf16> to vector<16x128xbf16>
    %8 = tpu.concatenate %4, %5, %6, %7 in 1 : vector<16x128xbf16>, vector<16x128xbf16>, vector<16x128xbf16>, vector<16x128xbf16> -> vector<16x512xbf16>
    %c0_3 = arith.constant 0 : index
    %c0_4 = arith.constant 0 : index
    %9 = vector.load %arg3[%c0_3, %c0_4] : memref<512x128xbf16, #tpu.memory_space<vmem>>, vector<512x128xbf16>
    %cst_5 = arith.constant dense<0.000000e+00> : vector<16x128xf32>
    %10 = tpu.matmul %8, %9, %cst_5 {dimension_numbers = #tpu.dot_dimension_numbers<[1], [0], [0], [1], [0, 0, 1, 1], [], []>} : vector<16x512xbf16>, vector<512x128xbf16>, vector<16x128xf32> -> vector<16x128xf32>
    %c0_6 = arith.constant 0 : index
    %c0_7 = arith.constant 0 : index
    %11 = vector.load %arg4[%c0_6, %c0_7] : memref<1x128xf32, #tpu.memory_space<vmem>>, vector<1x128xf32>
    %12 = vector.broadcast %11 : vector<1x128xf32> to vector<16x128xf32>
    %13 = arith.addf %10, %12 : vector<16x128xf32>
    %cst_8 = arith.constant 0.000000e+00 : f32
    %14 = vector.broadcast %cst_8 : f32 to vector<16x128xf32>
    %15 = arith.maximumf %13, %14 : vector<16x128xf32>
    %c0_9 = arith.constant 0 : index
    %c0_10 = arith.constant 0 : index
    %16 = vector.load %arg5[%c0_9, %c0_10] : memref<32x16xbf16, #tpu.memory_space<vmem>>, vector<32x16xbf16>
    %17 = arith.truncf %15 : vector<16x128xf32> to vector<16x128xbf16>
    %cst_11 = arith.constant dense<0.000000e+00> : vector<32x128xf32>
    %18 = tpu.matmul %16, %17, %cst_11 {dimension_numbers = #tpu.dot_dimension_numbers<[1], [0], [0], [1], [0, 0, 1, 1], [], []>} : vector<32x16xbf16>, vector<16x128xbf16>, vector<32x128xf32> -> vector<32x128xf32>
    %19 = arith.truncf %18 : vector<32x128xf32> to vector<32x128xbf16>
    %20 = vector.extract_strided_slice %19 {offsets = [0, 0], sizes = [8, 128], strides = [1, 1]} : vector<32x128xbf16> to vector<8x128xbf16>
    %21 = vector.extract_strided_slice %19 {offsets = [8, 0], sizes = [8, 128], strides = [1, 1]} : vector<32x128xbf16> to vector<8x128xbf16>
    %22 = vector.extract_strided_slice %19 {offsets = [16, 0], sizes = [8, 128], strides = [1, 1]} : vector<32x128xbf16> to vector<8x128xbf16>
    %23 = vector.extract_strided_slice %19 {offsets = [24, 0], sizes = [8, 128], strides = [1, 1]} : vector<32x128xbf16> to vector<8x128xbf16>
    %24 = tpu.concatenate %20, %21, %22, %23 in 1 : vector<8x128xbf16>, vector<8x128xbf16>, vector<8x128xbf16>, vector<8x128xbf16> -> vector<8x512xbf16>
    %c0_12 = arith.constant 0 : index
    %c0_13 = arith.constant 0 : index
    %25 = vector.load %arg6[%c0_12, %c0_13] : memref<512x128xbf16, #tpu.memory_space<vmem>>, vector<512x128xbf16>
    %cst_14 = arith.constant dense<0.000000e+00> : vector<8x128xf32>
    %26 = tpu.matmul %24, %25, %cst_14 {dimension_numbers = #tpu.dot_dimension_numbers<[1], [0], [0], [1], [0, 0, 1, 1], [], []>} : vector<8x512xbf16>, vector<512x128xbf16>, vector<8x128xf32> -> vector<8x128xf32>
    %c0_15 = arith.constant 0 : index
    %c0_16 = arith.constant 0 : index
    %27 = vector.load %arg7[%c0_15, %c0_16] : memref<1x128xf32, #tpu.memory_space<vmem>>, vector<1x128xf32>
    %28 = vector.broadcast %27 : vector<1x128xf32> to vector<8x128xf32>
    %29 = arith.addf %26, %28 : vector<8x128xf32>
    %cst_17 = arith.constant 0.000000e+00 : f32
    %30 = vector.broadcast %cst_17 : f32 to vector<8x128xf32>
    %31 = arith.maximumf %29, %30 : vector<8x128xf32>
    %c0_18 = arith.constant 0 : index
    %c0_19 = arith.constant 0 : index
    %32 = vector.load %arg8[%c0_18, %c0_19] : memref<16x8xbf16, #tpu.memory_space<vmem>>, vector<16x8xbf16>
    %33 = arith.truncf %31 : vector<8x128xf32> to vector<8x128xbf16>
    %cst_20 = arith.constant dense<0.000000e+00> : vector<16x128xf32>
    %34 = tpu.matmul %32, %33, %cst_20 {dimension_numbers = #tpu.dot_dimension_numbers<[1], [0], [0], [1], [0, 0, 1, 1], [], []>} : vector<16x8xbf16>, vector<8x128xbf16>, vector<16x128xf32> -> vector<16x128xf32>
    %35 = arith.truncf %34 : vector<16x128xf32> to vector<16x128xbf16>
    %36 = vector.extract_strided_slice %35 {offsets = [0, 0], sizes = [4, 128], strides = [1, 1]} : vector<16x128xbf16> to vector<4x128xbf16>
    %37 = vector.extract_strided_slice %35 {offsets = [4, 0], sizes = [4, 128], strides = [1, 1]} : vector<16x128xbf16> to vector<4x128xbf16>
    %38 = vector.extract_strided_slice %35 {offsets = [8, 0], sizes = [4, 128], strides = [1, 1]} : vector<16x128xbf16> to vector<4x128xbf16>
    %39 = vector.extract_strided_slice %35 {offsets = [12, 0], sizes = [4, 128], strides = [1, 1]} : vector<16x128xbf16> to vector<4x128xbf16>
    %40 = tpu.concatenate %36, %37, %38, %39 in 1 : vector<4x128xbf16>, vector<4x128xbf16>, vector<4x128xbf16>, vector<4x128xbf16> -> vector<4x512xbf16>
    %c0_21 = arith.constant 0 : index
    %c0_22 = arith.constant 0 : index
    %41 = vector.load %arg9[%c0_21, %c0_22] : memref<512x128xbf16, #tpu.memory_space<vmem>>, vector<512x128xbf16>
    %cst_23 = arith.constant dense<0.000000e+00> : vector<4x128xf32>
    %42 = tpu.matmul %40, %41, %cst_23 {dimension_numbers = #tpu.dot_dimension_numbers<[1], [0], [0], [1], [0, 0, 1, 1], [], []>} : vector<4x512xbf16>, vector<512x128xbf16>, vector<4x128xf32> -> vector<4x128xf32>
    %c0_24 = arith.constant 0 : index
    %c0_25 = arith.constant 0 : index
    %43 = vector.load %arg10[%c0_24, %c0_25] : memref<1x128xf32, #tpu.memory_space<vmem>>, vector<1x128xf32>
    %44 = vector.broadcast %43 : vector<1x128xf32> to vector<4x128xf32>
    %45 = arith.addf %42, %44 : vector<4x128xf32>
    %cst_26 = arith.constant 0.000000e+00 : f32
    %46 = vector.broadcast %cst_26 : f32 to vector<4x128xf32>
    %47 = arith.maximumf %45, %46 : vector<4x128xf32>
    %c0_27 = arith.constant 0 : index
    %c0_28 = arith.constant 0 : index
    %48 = vector.load %arg11[%c0_27, %c0_28] : memref<4x4xbf16, #tpu.memory_space<vmem>>, vector<4x4xbf16>
    %49 = arith.truncf %47 : vector<4x128xf32> to vector<4x128xbf16>
    %cst_29 = arith.constant dense<0.000000e+00> : vector<4x128xf32>
    %50 = tpu.matmul %48, %49, %cst_29 {dimension_numbers = #tpu.dot_dimension_numbers<[1], [0], [0], [1], [0, 0, 1, 1], [], []>} : vector<4x4xbf16>, vector<4x128xbf16>, vector<4x128xf32> -> vector<4x128xf32>
    %51 = arith.truncf %50 : vector<4x128xf32> to vector<4x128xbf16>
    %52 = vector.extract_strided_slice %51 {offsets = [0, 0], sizes = [2, 128], strides = [1, 1]} : vector<4x128xbf16> to vector<2x128xbf16>
    %53 = vector.extract_strided_slice %51 {offsets = [2, 0], sizes = [2, 128], strides = [1, 1]} : vector<4x128xbf16> to vector<2x128xbf16>
    %54 = tpu.concatenate %52, %53 in 1 : vector<2x128xbf16>, vector<2x128xbf16> -> vector<2x256xbf16>
    %c0_30 = arith.constant 0 : index
    %c0_31 = arith.constant 0 : index
    %55 = vector.load %arg12[%c0_30, %c0_31] : memref<256x128xbf16, #tpu.memory_space<vmem>>, vector<256x128xbf16>
    %cst_32 = arith.constant dense<0.000000e+00> : vector<2x128xf32>
    %56 = tpu.matmul %54, %55, %cst_32 {dimension_numbers = #tpu.dot_dimension_numbers<[1], [0], [0], [1], [0, 0, 1, 1], [], []>} : vector<2x256xbf16>, vector<256x128xbf16>, vector<2x128xf32> -> vector<2x128xf32>
    %c0_33 = arith.constant 0 : index
    %c0_34 = arith.constant 0 : index
    %57 = vector.load %arg13[%c0_33, %c0_34] : memref<1x128xf32, #tpu.memory_space<vmem>>, vector<1x128xf32>
    %58 = vector.broadcast %57 : vector<1x128xf32> to vector<2x128xf32>
    %59 = arith.addf %56, %58 : vector<2x128xf32>
    %cst_35 = arith.constant 0.000000e+00 : f32
    %60 = vector.broadcast %cst_35 : f32 to vector<2x128xf32>
    %61 = arith.maximumf %59, %60 : vector<2x128xf32>
    %62 = arith.truncf %61 : vector<2x128xf32> to vector<2x128xbf16>
    %c0_36 = arith.constant 0 : index
    %c0_37 = arith.constant 0 : index
    %63 = vector.load %arg14[%c0_36, %c0_37] : memref<128x128xbf16, #tpu.memory_space<vmem>>, vector<128x128xbf16>
    %cst_38 = arith.constant dense<0.000000e+00> : vector<2x128xf32>
    %64 = tpu.matmul %62, %63, %cst_38 {dimension_numbers = #tpu.dot_dimension_numbers<[1], [0], [0], [1], [0, 0, 1, 1], [], []>} : vector<2x128xbf16>, vector<128x128xbf16>, vector<2x128xf32> -> vector<2x128xf32>
    %c0_39 = arith.constant 0 : index
    %c0_40 = arith.constant 0 : index
    %65 = vector.load %arg15[%c0_39, %c0_40] : memref<1x128xf32, #tpu.memory_space<vmem>>, vector<1x128xf32>
    %66 = vector.broadcast %65 : vector<1x128xf32> to vector<2x128xf32>
    %67 = arith.addf %64, %66 : vector<2x128xf32>
    %68 = arith.truncf %67 : vector<2x128xf32> to vector<2x128xbf16>
    %c0_41 = arith.constant 0 : index
    %c0_42 = arith.constant 0 : index
    %69 = vector.load %arg16[%c0_41, %c0_42] : memref<128x128xbf16, #tpu.memory_space<vmem>>, vector<128x128xbf16>
    %cst_43 = arith.constant dense<0.000000e+00> : vector<2x128xf32>
    %70 = tpu.matmul %68, %69, %cst_43 {dimension_numbers = #tpu.dot_dimension_numbers<[1], [0], [0], [1], [0, 0, 1, 1], [], []>} : vector<2x128xbf16>, vector<128x128xbf16>, vector<2x128xf32> -> vector<2x128xf32>
    %c0_44 = arith.constant 0 : index
    %c0_45 = arith.constant 0 : index
    %71 = vector.load %arg17[%c0_44, %c0_45] : memref<1x128xf32, #tpu.memory_space<vmem>>, vector<1x128xf32>
    %72 = vector.broadcast %71 : vector<1x128xf32> to vector<2x128xf32>
    %73 = arith.addf %70, %72 : vector<2x128xf32>
    %cst_46 = arith.constant 0.000000e+00 : f32
    %74 = vector.broadcast %cst_46 : f32 to vector<2x128xf32>
    %75 = arith.maximumf %73, %74 : vector<2x128xf32>
    %76 = arith.truncf %75 : vector<2x128xf32> to vector<2x128xbf16>
    %c0_47 = arith.constant 0 : index
    %c0_48 = arith.constant 0 : index
    %77 = vector.load %arg18[%c0_47, %c0_48] : memref<128x256xbf16, #tpu.memory_space<vmem>>, vector<128x256xbf16>
    %cst_49 = arith.constant dense<0.000000e+00> : vector<2x256xf32>
    %78 = tpu.matmul %76, %77, %cst_49 {dimension_numbers = #tpu.dot_dimension_numbers<[1], [0], [0], [1], [0, 0, 1, 1], [], []>} : vector<2x128xbf16>, vector<128x256xbf16>, vector<2x256xf32> -> vector<2x256xf32>
    %79 = vector.extract_strided_slice %78 {offsets = [0, 0], sizes = [2, 128], strides = [1, 1]} : vector<2x256xf32> to vector<2x128xf32>
    %80 = vector.extract_strided_slice %78 {offsets = [0, 128], sizes = [2, 128], strides = [1, 1]} : vector<2x256xf32> to vector<2x128xf32>
    %81 = tpu.concatenate %79, %80 in 0 : vector<2x128xf32>, vector<2x128xf32> -> vector<4x128xf32>
    %82 = arith.truncf %81 : vector<4x128xf32> to vector<4x128xbf16>
    %c0_50 = arith.constant 0 : index
    %c0_51 = arith.constant 0 : index
    %83 = vector.load %arg19[%c0_50, %c0_51] : memref<4x4xbf16, #tpu.memory_space<vmem>>, vector<4x4xbf16>
    %cst_52 = arith.constant dense<0.000000e+00> : vector<4x128xf32>
    %84 = tpu.matmul %83, %82, %cst_52 {dimension_numbers = #tpu.dot_dimension_numbers<[1], [0], [0], [1], [0, 0, 1, 1], [], []>} : vector<4x4xbf16>, vector<4x128xbf16>, vector<4x128xf32> -> vector<4x128xf32>
    %c0_53 = arith.constant 0 : index
    %c0_54 = arith.constant 0 : index
    %85 = vector.load %arg20[%c0_53, %c0_54] : memref<4x128xf32, #tpu.memory_space<vmem>>, vector<4x128xf32>
    %86 = arith.addf %84, %85 : vector<4x128xf32>
    %cst_55 = arith.constant 0.000000e+00 : f32
    %87 = vector.broadcast %cst_55 : f32 to vector<4x128xf32>
    %88 = arith.maximumf %86, %87 : vector<4x128xf32>
    %89 = arith.truncf %88 : vector<4x128xf32> to vector<4x128xbf16>
    %c0_56 = arith.constant 0 : index
    %c0_57 = arith.constant 0 : index
    %90 = vector.load %arg21[%c0_56, %c0_57] : memref<128x512xbf16, #tpu.memory_space<vmem>>, vector<128x512xbf16>
    %cst_58 = arith.constant dense<0.000000e+00> : vector<4x512xf32>
    %91 = tpu.matmul %89, %90, %cst_58 {dimension_numbers = #tpu.dot_dimension_numbers<[1], [0], [0], [1], [0, 0, 1, 1], [], []>} : vector<4x128xbf16>, vector<128x512xbf16>, vector<4x512xf32> -> vector<4x512xf32>
    %92 = vector.extract_strided_slice %91 {offsets = [0, 0], sizes = [4, 128], strides = [1, 1]} : vector<4x512xf32> to vector<4x128xf32>
    %93 = vector.extract_strided_slice %91 {offsets = [0, 128], sizes = [4, 128], strides = [1, 1]} : vector<4x512xf32> to vector<4x128xf32>
    %94 = vector.extract_strided_slice %91 {offsets = [0, 256], sizes = [4, 128], strides = [1, 1]} : vector<4x512xf32> to vector<4x128xf32>
    %95 = vector.extract_strided_slice %91 {offsets = [0, 384], sizes = [4, 128], strides = [1, 1]} : vector<4x512xf32> to vector<4x128xf32>
    %96 = tpu.concatenate %92, %93, %94, %95 in 0 : vector<4x128xf32>, vector<4x128xf32>, vector<4x128xf32>, vector<4x128xf32> -> vector<16x128xf32>
    %97 = arith.truncf %96 : vector<16x128xf32> to vector<16x128xbf16>
    %c0_59 = arith.constant 0 : index
    %c0_60 = arith.constant 0 : index
    %98 = vector.load %arg22[%c0_59, %c0_60] : memref<8x16xbf16, #tpu.memory_space<vmem>>, vector<8x16xbf16>
    %cst_61 = arith.constant dense<0.000000e+00> : vector<8x128xf32>
    %99 = tpu.matmul %98, %97, %cst_61 {dimension_numbers = #tpu.dot_dimension_numbers<[1], [0], [0], [1], [0, 0, 1, 1], [], []>} : vector<8x16xbf16>, vector<16x128xbf16>, vector<8x128xf32> -> vector<8x128xf32>
    %c0_62 = arith.constant 0 : index
    %c0_63 = arith.constant 0 : index
    %100 = vector.load %arg23[%c0_62, %c0_63] : memref<1x128xf32, #tpu.memory_space<vmem>>, vector<1x128xf32>
    %101 = vector.broadcast %100 : vector<1x128xf32> to vector<8x128xf32>
    %102 = arith.addf %99, %101 : vector<8x128xf32>
    %cst_64 = arith.constant 0.000000e+00 : f32
    %103 = vector.broadcast %cst_64 : f32 to vector<8x128xf32>
    %104 = arith.maximumf %102, %103 : vector<8x128xf32>
    %105 = arith.truncf %104 : vector<8x128xf32> to vector<8x128xbf16>
    %c0_65 = arith.constant 0 : index
    %c0_66 = arith.constant 0 : index
    %106 = vector.load %arg24[%c0_65, %c0_66] : memref<128x512xbf16, #tpu.memory_space<vmem>>, vector<128x512xbf16>
    %cst_67 = arith.constant dense<0.000000e+00> : vector<8x512xf32>
    %107 = tpu.matmul %105, %106, %cst_67 {dimension_numbers = #tpu.dot_dimension_numbers<[1], [0], [0], [1], [0, 0, 1, 1], [], []>} : vector<8x128xbf16>, vector<128x512xbf16>, vector<8x512xf32> -> vector<8x512xf32>
    %108 = vector.extract_strided_slice %107 {offsets = [0, 0], sizes = [8, 128], strides = [1, 1]} : vector<8x512xf32> to vector<8x128xf32>
    %109 = vector.extract_strided_slice %107 {offsets = [0, 128], sizes = [8, 128], strides = [1, 1]} : vector<8x512xf32> to vector<8x128xf32>
    %110 = vector.extract_strided_slice %107 {offsets = [0, 256], sizes = [8, 128], strides = [1, 1]} : vector<8x512xf32> to vector<8x128xf32>
    %111 = vector.extract_strided_slice %107 {offsets = [0, 384], sizes = [8, 128], strides = [1, 1]} : vector<8x512xf32> to vector<8x128xf32>
    %112 = tpu.concatenate %108, %109, %110, %111 in 0 : vector<8x128xf32>, vector<8x128xf32>, vector<8x128xf32>, vector<8x128xf32> -> vector<32x128xf32>
    %113 = arith.truncf %112 : vector<32x128xf32> to vector<32x128xbf16>
    %c0_68 = arith.constant 0 : index
    %c0_69 = arith.constant 0 : index
    %114 = vector.load %arg25[%c0_68, %c0_69] : memref<16x32xbf16, #tpu.memory_space<vmem>>, vector<16x32xbf16>
    %cst_70 = arith.constant dense<0.000000e+00> : vector<16x128xf32>
    %115 = tpu.matmul %114, %113, %cst_70 {dimension_numbers = #tpu.dot_dimension_numbers<[1], [0], [0], [1], [0, 0, 1, 1], [], []>} : vector<16x32xbf16>, vector<32x128xbf16>, vector<16x128xf32> -> vector<16x128xf32>
    %c0_71 = arith.constant 0 : index
    %c0_72 = arith.constant 0 : index
    %116 = vector.load %arg26[%c0_71, %c0_72] : memref<1x128xf32, #tpu.memory_space<vmem>>, vector<1x128xf32>
    %117 = vector.broadcast %116 : vector<1x128xf32> to vector<16x128xf32>
    %118 = arith.addf %115, %117 : vector<16x128xf32>
    %cst_73 = arith.constant 0.000000e+00 : f32
    %119 = vector.broadcast %cst_73 : f32 to vector<16x128xf32>
    %120 = arith.maximumf %118, %119 : vector<16x128xf32>
    %121 = arith.truncf %120 : vector<16x128xf32> to vector<16x128xbf16>
    %c0_74 = arith.constant 0 : index
    %c0_75 = arith.constant 0 : index
    %122 = vector.load %arg27[%c0_74, %c0_75] : memref<128x512xbf16, #tpu.memory_space<vmem>>, vector<128x512xbf16>
    %cst_76 = arith.constant dense<0.000000e+00> : vector<16x512xf32>
    %123 = tpu.matmul %121, %122, %cst_76 {dimension_numbers = #tpu.dot_dimension_numbers<[1], [0], [0], [1], [0, 0, 1, 1], [], []>} : vector<16x128xbf16>, vector<128x512xbf16>, vector<16x512xf32> -> vector<16x512xf32>
    %124 = vector.extract_strided_slice %123 {offsets = [0, 0], sizes = [16, 128], strides = [1, 1]} : vector<16x512xf32> to vector<16x128xf32>
    %125 = vector.extract_strided_slice %123 {offsets = [0, 128], sizes = [16, 128], strides = [1, 1]} : vector<16x512xf32> to vector<16x128xf32>
    %126 = vector.extract_strided_slice %123 {offsets = [0, 256], sizes = [16, 128], strides = [1, 1]} : vector<16x512xf32> to vector<16x128xf32>
    %127 = vector.extract_strided_slice %123 {offsets = [0, 384], sizes = [16, 128], strides = [1, 1]} : vector<16x512xf32> to vector<16x128xf32>
    %128 = tpu.concatenate %124, %125, %126, %127 in 0 : vector<16x128xf32>, vector<16x128xf32>, vector<16x128xf32>, vector<16x128xf32> -> vector<64x128xf32>
    %129 = arith.truncf %128 : vector<64x128xf32> to vector<64x128xbf16>
    %c0_77 = arith.constant 0 : index
    %c0_78 = arith.constant 0 : index
    %130 = vector.load %arg28[%c0_77, %c0_78] : memref<32x64xbf16, #tpu.memory_space<vmem>>, vector<32x64xbf16>
    %cst_79 = arith.constant dense<0.000000e+00> : vector<32x128xf32>
    %131 = tpu.matmul %130, %129, %cst_79 {dimension_numbers = #tpu.dot_dimension_numbers<[1], [0], [0], [1], [0, 0, 1, 1], [], []>} : vector<32x64xbf16>, vector<64x128xbf16>, vector<32x128xf32> -> vector<32x128xf32>
    %c0_80 = arith.constant 0 : index
    %c0_81 = arith.constant 0 : index
    %132 = vector.load %arg29[%c0_80, %c0_81] : memref<1x128xf32, #tpu.memory_space<vmem>>, vector<1x128xf32>
    %133 = vector.broadcast %132 : vector<1x128xf32> to vector<32x128xf32>
    %134 = arith.addf %131, %133 : vector<32x128xf32>
    %c0_82 = arith.constant 0 : index
    %c0_83 = arith.constant 0 : index
    %135 = vector.load %arg30[%c0_82, %c0_83] : memref<32x128xf32, #tpu.memory_space<vmem>>, vector<32x128xf32>
    tpu.vector_store %arg30[%c0_82, %c0_83], %134 {strides = array<i32>} : memref<32x128xf32, #tpu.memory_space<vmem>>, vector<32x128xf32>,
    return
  }
  func.func @transform_0(%arg0: i32) -> (i32, i32) {
    %c0_i32 = arith.constant 0 : i32
    %c0_i32_0 = arith.constant 0 : i32
    return %arg0, %c0_i32 : i32, i32
  }
  func.func @transform_1(%arg0: i32) -> (i32, i32) {
    %c0_i32 = arith.constant 0 : i32
    %c0_i32_0 = arith.constant 0 : i32
    %c0_i32_1 = arith.constant 0 : i32
    return %c0_i32, %c0_i32_0 : i32, i32
  }
  func.func @transform_2(%arg0: i32) -> (i32, i32) {
    %c0_i32 = arith.constant 0 : i32
    %c0_i32_0 = arith.constant 0 : i32
    %c0_i32_1 = arith.constant 0 : i32
    return %c0_i32, %c0_i32_0 : i32, i32
  }
  func.func @transform_3(%arg0: i32) -> (i32, i32) {
    %c0_i32 = arith.constant 0 : i32
    %c0_i32_0 = arith.constant 0 : i32
    %c0_i32_1 = arith.constant 0 : i32
    return %c0_i32, %c0_i32_0 : i32, i32
  }
  func.func @transform_4(%arg0: i32) -> (i32, i32) {
    %c0_i32 = arith.constant 0 : i32
    %c0_i32_0 = arith.constant 0 : i32
    %c0_i32_1 = arith.constant 0 : i32
    return %c0_i32, %c0_i32_0 : i32, i32
  }
  func.func @transform_5(%arg0: i32) -> (i32, i32) {
    %c0_i32 = arith.constant 0 : i32
    %c0_i32_0 = arith.constant 0 : i32
    %c0_i32_1 = arith.constant 0 : i32
    return %c0_i32, %c0_i32_0 : i32, i32
  }
  func.func @transform_6(%arg0: i32) -> (i32, i32) {
    %c0_i32 = arith.constant 0 : i32
    %c0_i32_0 = arith.constant 0 : i32
    %c0_i32_1 = arith.constant 0 : i32
    return %c0_i32, %c0_i32_0 : i32, i32
  }
  func.func @transform_7(%arg0: i32) -> (i32, i32) {
    %c0_i32 = arith.constant 0 : i32
    %c0_i32_0 = arith.constant 0 : i32
    %c0_i32_1 = arith.constant 0 : i32
    return %c0_i32, %c0_i32_0 : i32, i32
  }
  func.func @transform_8(%arg0: i32) -> (i32, i32) {
    %c0_i32 = arith.constant 0 : i32
    %c0_i32_0 = arith.constant 0 : i32
    %c0_i32_1 = arith.constant 0 : i32
    return %c0_i32, %c0_i32_0 : i32, i32
  }
  func.func @transform_9(%arg0: i32) -> (i32, i32) {
    %c0_i32 = arith.constant 0 : i32
    %c0_i32_0 = arith.constant 0 : i32
    %c0_i32_1 = arith.constant 0 : i32
    return %c0_i32, %c0_i32_0 : i32, i32
  }
  func.func @transform_10(%arg0: i32) -> (i32, i32) {
    %c0_i32 = arith.constant 0 : i32
    %c0_i32_0 = arith.constant 0 : i32
    %c0_i32_1 = arith.constant 0 : i32
    return %c0_i32, %c0_i32_0 : i32, i32
  }
  func.func @transform_11(%arg0: i32) -> (i32, i32) {
    %c0_i32 = arith.constant 0 : i32
    %c0_i32_0 = arith.constant 0 : i32
    %c0_i32_1 = arith.constant 0 : i32
    return %c0_i32, %c0_i32_0 : i32, i32
  }
  func.func @transform_12(%arg0: i32) -> (i32, i32) {
    %c0_i32 = arith.constant 0 : i32
    %c0_i32_0 = arith.constant 0 : i32
    %c0_i32_1 = arith.constant 0 : i32
    return %c0_i32, %c0_i32_0 : i32, i32
  }
  func.func @transform_13(%arg0: i32) -> (i32, i32) {
    %c0_i32 = arith.constant 0 : i32
    %c0_i32_0 = arith.constant 0 : i32
    %c0_i32_1 = arith.constant 0 : i32
    return %c0_i32, %c0_i32_0 : i32, i32
  }
  func.func @transform_14(%arg0: i32) -> (i32, i32) {
    %c0_i32 = arith.constant 0 : i32
    %c0_i32_0 = arith.constant 0 : i32
    %c0_i32_1 = arith.constant 0 : i32
    return %c0_i32, %c0_i32_0 : i32, i32
  }
  func.func @transform_15(%arg0: i32) -> (i32, i32) {
    %c0_i32 = arith.constant 0 : i32
    %c0_i32_0 = arith.constant 0 : i32
    %c0_i32_1 = arith.constant 0 : i32
    return %c0_i32, %c0_i32_0 : i32, i32
  }
  func.func @transform_16(%arg0: i32) -> (i32, i32) {
    %c0_i32 = arith.constant 0 : i32
    %c0_i32_0 = arith.constant 0 : i32
    %c0_i32_1 = arith.constant 0 : i32
    return %c0_i32, %c0_i32_0 : i32, i32
  }
  func.func @transform_17(%arg0: i32) -> (i32, i32) {
    %c0_i32 = arith.constant 0 : i32
    %c0_i32_0 = arith.constant 0 : i32
    %c0_i32_1 = arith.constant 0 : i32
    return %c0_i32, %c0_i32_0 : i32, i32
  }
  func.func @transform_18(%arg0: i32) -> (i32, i32) {
    %c0_i32 = arith.constant 0 : i32
    %c0_i32_0 = arith.constant 0 : i32
    %c0_i32_1 = arith.constant 0 : i32
    return %c0_i32, %c0_i32_0 : i32, i32
  }
  func.func @transform_19(%arg0: i32) -> (i32, i32) {
    %c0_i32 = arith.constant 0 : i32
    %c0_i32_0 = arith.constant 0 : i32
    %c0_i32_1 = arith.constant 0 : i32
    return %c0_i32, %c0_i32_0 : i32, i32
  }
  func.func @transform_20(%arg0: i32) -> (i32, i32) {
    %c0_i32 = arith.constant 0 : i32
    %c0_i32_0 = arith.constant 0 : i32
    %c0_i32_1 = arith.constant 0 : i32
    return %c0_i32, %c0_i32_0 : i32, i32
  }
  func.func @transform_21(%arg0: i32) -> (i32, i32) {
    %c0_i32 = arith.constant 0 : i32
    %c0_i32_0 = arith.constant 0 : i32
    %c0_i32_1 = arith.constant 0 : i32
    return %c0_i32, %c0_i32_0 : i32, i32
  }
  func.func @transform_22(%arg0: i32) -> (i32, i32) {
    %c0_i32 = arith.constant 0 : i32
    %c0_i32_0 = arith.constant 0 : i32
    %c0_i32_1 = arith.constant 0 : i32
    return %c0_i32, %c0_i32_0 : i32, i32
  }
  func.func @transform_23(%arg0: i32) -> (i32, i32) {
    %c0_i32 = arith.constant 0 : i32
    %c0_i32_0 = arith.constant 0 : i32
    %c0_i32_1 = arith.constant 0 : i32
    return %c0_i32, %c0_i32_0 : i32, i32
  }
  func.func @transform_24(%arg0: i32) -> (i32, i32) {
    %c0_i32 = arith.constant 0 : i32
    %c0_i32_0 = arith.constant 0 : i32
    %c0_i32_1 = arith.constant 0 : i32
    return %c0_i32, %c0_i32_0 : i32, i32
  }
  func.func @transform_25(%arg0: i32) -> (i32, i32) {
    %c0_i32 = arith.constant 0 : i32
    %c0_i32_0 = arith.constant 0 : i32
    %c0_i32_1 = arith.constant 0 : i32
    return %c0_i32, %c0_i32_0 : i32, i32
  }
  func.func @transform_26(%arg0: i32) -> (i32, i32) {
    %c0_i32 = arith.constant 0 : i32
    %c0_i32_0 = arith.constant 0 : i32
    %c0_i32_1 = arith.constant 0 : i32
    return %c0_i32, %c0_i32_0 : i32, i32
  }
  func.func @transform_27(%arg0: i32) -> (i32, i32) {
    %c0_i32 = arith.constant 0 : i32
    %c0_i32_0 = arith.constant 0 : i32
    %c0_i32_1 = arith.constant 0 : i32
    return %c0_i32, %c0_i32_0 : i32, i32
  }
  func.func @transform_28(%arg0: i32) -> (i32, i32) {
    %c0_i32 = arith.constant 0 : i32
    %c0_i32_0 = arith.constant 0 : i32
    %c0_i32_1 = arith.constant 0 : i32
    return %c0_i32, %c0_i32_0 : i32, i32
  }
  func.func @transform_29(%arg0: i32) -> (i32, i32) {
    %c0_i32 = arith.constant 0 : i32
    %c0_i32_0 = arith.constant 0 : i32
    return %arg0, %c0_i32 : i32, i32
  }
}

</mosaic_0001>

<bundles_post_ra>
// kernel: autoencoder_forward.1
= control target key start
LH: loop header
LB: loop body
LE: loop exit
PB: predicated region body
PF: predicated region fallthrough
CT: control target
= control target key end

     0   :  { %s4661_s6 = smov 1   ;;  %s4662_s10 = smov 2   ;;  %s5116_s0 = inlined_call_operand.smem [shape: u32[30], index: -1, kind: input, shape index: {}] }
   0x1   :  { %s4723_s5 = sld [smem:[%s5116_s0]]   ;;  %s4663_s14 = smov 3  }
   0x2   :  { %s4728_s9 = sld [smem:[%s5116_s0 + %s4661_s6]]   ;;  %s4664_s18 = smov 4  }
   0x3   :  { %s4733_s13 = sld [smem:[%s5116_s0 + %s4662_s10]]   ;;  %s4665_s22 = smov 5  }
   0x4   :  { %s4738_s17 = sld [smem:[%s5116_s0 + %s4663_s14]]   ;;  %s4666_s26 = smov 6  }
   0x5   :  { %s4743_s21 = sld [smem:[%s5116_s0 + %s4664_s18]]   ;;  %s4667_s30 = smov 7  }
   0x6   :  { %s4748_s25 = sld [smem:[%s5116_s0 + %s4665_s22]]   ;;  %s4668_s4 = smov 8  }
   0x7   :  { %5123 = sst [smem:[#allocation36_spill]] %s4723_s5  ;;  %s4669_s10 = smov 9  }
   0x8   :  { %5124 = sst [smem:[#allocation37_spill]] %s4728_s9  ;;  %s4670_s15 = smov 10  }
   0x9   :  { %5125 = sst [smem:[#allocation38_spill]] %s4733_s13  ;;  %s4671_s20 = smov 11  }
   0xa   :  { %5126 = sst [smem:[#allocation39_spill]] %s4738_s17  ;;  %s4673_s1 = smov 13  }
   0xb   :  { %5127 = sst [smem:[#allocation40_spill]] %s4743_s21  ;;  %s4674_s7 = smov 14  }
   0xc   :  { %s4753_s29 = sld [smem:[%s5116_s0 + %s4666_s26]]   ;;  %s4672_s26 = smov 12  }
   0xd   :  { %s4758_s3 = sld [smem:[%s5116_s0 + %s4667_s30]]   ;;  %s4676_s22 = smov 16  }
   0xe   :  { %s4763_s8 = sld [smem:[%s5116_s0 + %s4668_s4]]   ;;  %s4677_s28 = smov 17  }
   0xf   :  { %s4768_s14 = sld [smem:[%s5116_s0 + %s4669_s10]]  }
  0x10   :  { %s4773_s19 = sld [smem:[%s5116_s0 + %s4670_s15]]   ;;  %s4675_s15 = smov 15  }
  0x11   :  { %s4778_s24 = sld [smem:[%s5116_s0 + %s4671_s20]]  }
  0x12   :  { %s4783_s30 = sld [smem:[%s5116_s0 + %s4672_s26]]  }
  0x13   :  { %5128 = sst [smem:[#allocation41_spill]] %s4758_s3 }
  0x14   :  { %s4788_s6 = sld [smem:[%s5116_s0 + %s4673_s1]]  }
  0x15   :  { %s4793_s12 = sld [smem:[%s5116_s0 + %s4674_s7]]   ;;  %s4678_s7 = smov 18  }
  0x16   :  { %s4798_s20 = sld [smem:[%s5116_s0 + %s4675_s15]]   ;;  %s4679_s15 = smov 19  }
  0x17   :  { %s4803_s27 = sld [smem:[%s5116_s0 + %s4676_s22]]   ;;  %s4680_s22 = smov 20  }
  0x18   :  { %s4808_s4 = sld [smem:[%s5116_s0 + %s4677_s28]]   ;;  %s4681_s28 = smov 21  }
  0x19   :  { %s4813_s3 = sld [smem:[%s5116_s0 + %s4678_s7]]   ;;  %s4682_s7 = smov 22  }
  0x1a   :  { %s4818_s17 = sld [smem:[%s5116_s0 + %s4679_s15]]   ;;  %s4683_s15 = smov 23  }
  0x1b   :  { %s4823_s21 = sld [smem:[%s5116_s0 + %s4680_s22]]   ;;  %s4684_s22 = smov 24  }
  0x1c   :  { %s4828_s13 = sld [smem:[%s5116_s0 + %s4681_s28]]   ;;  %s4685_s28 = smov 25  }
  0x1d   :  { %s4833_s9 = sld [smem:[%s5116_s0 + %s4682_s7]]   ;;  %s4686_s7 = smov 26  }
  0x1e   :  { %s4838_s5 = sld [smem:[%s5116_s0 + %s4683_s15]]   ;;  %s4687_s15 = smov 27  }
  0x21   :  { %5129 = sst [smem:[#allocation42_spill]] %s4823_s21 }
  0x22   :  { %5130 = sst [smem:[#allocation43_spill]] %s4828_s13 }
  0x23   :  { %5131 = sst [smem:[#allocation44_spill]] %s4833_s9 }
  0x24   :  { %5132 = sst [smem:[#allocation45_spill]] %s4838_s5 }
  0x25   :  { %s4843_s21 = sld [smem:[%s5116_s0 + %s4684_s22]]   ;;  %s4688_s22 = smov 28  }
  0x26   :  { %s4848_s13 = sld [smem:[%s5116_s0 + %s4685_s28]]   ;;  %s4689_s28 = smov 29  }
  0x27   :  { %s4853_s9 = sld [smem:[%s5116_s0 + %s4686_s7]]  }
  0x28   :  { %s4858_s5 = sld [smem:[%s5116_s0 + %s4687_s15]]  }
  0x2b   :  { %5133 = sst [smem:[#allocation46_spill]] %s4843_s21 }
  0x2c   :  { %5134 = sst [smem:[#allocation47_spill]] %s4848_s13 }
  0x2d   :  { %s4863_s21 = sld [smem:[%s5116_s0 + %s4688_s22]]  }
  0x2e   :  { %s4868_s13 = sld [smem:[%s5116_s0 + %s4689_s28]]  }
  0x2f   :  { %64 = vsyncpa [#allocation3], 0 }
  0x30   :  { %65 = vsyncpa [#allocation5], 0 }
  0x31   :  { %66 = vsyncpa [#allocation8], 0 }
  0x32   :  { %67 = vsyncpa [#allocation11], 0 }
  0x33   :  { %68 = vsyncpa [#allocation14], 0 }
  0x34   :  { %69 = vsyncpa [#allocation17], 0 }
  0x35   :  { %70 = vsyncpa [#allocation20], 0 }
  0x36   :  { %71 = vsyncpa [#allocation23], 0 }
  0x37   :  { %72 = vsyncpa [#allocation26], 0  ;;  %s4690_s7 = smov [#allocation4]   ;;  %s4691_s11 = smov [#allocation7]  }
  0x38   :  { %s101_s10 = sshll.u32 %s4690_s7, 4  ;;  %s125_s15 = sshll.u32 %s4691_s11, 4  ;;  %s102_s10 = int_to_ptr.vmem [resolvable:$true] %s101_s10  ;;  %s126_s15 = int_to_ptr.vmem [resolvable:$true] %s125_s15 }
  0x39   :  { %s4291_s0 = scalar_lea.hbm %s4753_s29, 16 }
  0x3a   :  { %p4292_p0 = scmp.ne.s32.totalorder %s4753_s29, %s4291_s0  ;;  %p4295_p1 = scmp.lt.u32.totalorder %s4291_s0, %s4753_s29 }
  0x3c   :  { %p4297_p2 = pnand %p4295_p1, %p4292_p0 }
  0x3e   :  { %4300 = shalt.err (!%p4297_p2)
}
  0x3f   :  { %s4301_s16 = scalar_lea.vmem %s102_s10, 16  ;;  %s4305_s18 = scalar_lea.vmem %s102_s10, 32 }
  0x40   :  { %p4302_p3 = scmp.ne.s32.totalorder %s102_s10, %s4301_s16  ;;  %p4306_p4 = scmp.lt.s32.totalorder %s102_s10, %s102_s10 }
  0x41   :  { %p4307_p5 = scmp.lt.s32.totalorder %s4305_s18, %s4301_s16 }
  0x43   :  { %p4308_p6 = por %p4307_p5, %p4306_p4 }
  0x45   :  { %p4309_p7 = pnand %p4308_p6, %p4302_p3 }
  0x47   :  { %4312 = shalt.err (!%p4309_p7)
}
  0x48   :  { %104 = dma.hbm_to_vmem [thread:$0]  %s4753_s29, 16, %s102_s10, [#allocation5]  }
  0x49   :  { %s4313_s22 = scalar_lea.hbm %s4768_s14, 16 }
  0x4a   :  { %p4314_p8 = scmp.ne.s32.totalorder %s4768_s14, %s4313_s22  ;;  %p4317_p9 = scmp.lt.u32.totalorder %s4313_s22, %s4768_s14 }
  0x4c   :  { %p4319_p10 = pnand %p4317_p9, %p4314_p8 }
  0x4e   :  { %4322 = shalt.err (!%p4319_p10)
}
  0x4f   :  { %s4323_s23 = scalar_lea.vmem %s126_s15, 16  ;;  %s4327_s26 = scalar_lea.vmem %s126_s15, 32 }
  0x50   :  { %p4324_p11 = scmp.ne.s32.totalorder %s126_s15, %s4323_s23  ;;  %p4328_p12 = scmp.lt.s32.totalorder %s126_s15, %s126_s15 }
  0x51   :  { %p4329_p13 = scmp.lt.s32.totalorder %s4327_s26, %s4323_s23 }
  0x53   :  { %p4330_p0 = por %p4329_p13, %p4328_p12 }
  0x55   :  { %p4331_p1 = pnand %p4330_p0, %p4324_p11 }
  0x57   :  { %4334 = shalt.err (!%p4331_p1)
}
  0x58   :  { %128 = dma.hbm_to_vmem [thread:$0]  %s4768_s14, 16, %s126_s15, [#allocation8]  }
  0x59   :  { %s4692_s28 = smov [#allocation10]   ;;  %s4693_s1 = smov [#allocation13]  }
  0x5a   :  { %s144_s29 = sshll.u32 %s4692_s28, 4  ;;  %s166_s2 = sshll.u32 %s4693_s1, 4  ;;  %s145_s29 = int_to_ptr.vmem [resolvable:$true] %s144_s29  ;;  %s4878_s2 = int_to_ptr.vmem [resolvable:$true] %s166_s2 }
  0x5b   :  { %s4335_s7 = scalar_lea.hbm %s4778_s24, 2048 }
  0x5c   :  { %p4336_p2 = scmp.ne.s32.totalorder %s4778_s24, %s4335_s7  ;;  %p4339_p3 = scmp.lt.u32.totalorder %s4335_s7, %s4778_s24 }
  0x5e   :  { %p4341_p4 = pnand %p4339_p3, %p4336_p2 }
  0x60   :  { %4344 = shalt.err (!%p4341_p4)
}
  0x61   :  { %s4345_s10 = scalar_lea.vmem %s145_s29, 2048  ;;  %p4350_p6 = scmp.lt.s32.totalorder %s145_s29, %s145_s29 }
  0x62   :  { %p4346_p5 = scmp.ne.s32.totalorder %s145_s29, %s4345_s10  ;;  %p4351_p7 = scmp.lt.s32.totalorder %s4345_s10, %s4345_s10 }
  0x64   :  { %p4352_p8 = por %p4351_p7, %p4350_p6 }
  0x66   :  { %p4353_p9 = pnand %p4352_p8, %p4346_p5 }
  0x68   :  { %4356 = shalt.err (!%p4353_p9)
}
  0x69   :  { %s4694_s14 = smov 64   ;;  %s4695_s11 = smov 4  }
  0x6a   :  { %150 = dma.hbm_to_vmem [thread:$0]  %s4778_s24, 2048, %s145_s29, [#allocation11], %s4694_s14, %s4694_s14, %s4695_s11  }
  0x6b   :  { %s4357_s15 = scalar_lea.hbm %s4788_s6, 1024 }
  0x6c   :  { %p4358_p10 = scmp.ne.s32.totalorder %s4788_s6, %s4357_s15  ;;  %p4361_p11 = scmp.lt.u32.totalorder %s4357_s15, %s4788_s6 }
  0x6e   :  { %p4363_p12 = pnand %p4361_p11, %p4358_p10 }
  0x70   :  { %4366 = shalt.err (!%p4363_p12)
}
  0x71   :  { %s4367_s0 = scalar_lea.vmem %s4878_s2, 1024  ;;  %p4372_p0 = scmp.lt.s32.totalorder %s4878_s2, %s4878_s2 }
  0x72   :  { %p4368_p13 = scmp.ne.s32.totalorder %s4878_s2, %s4367_s0  ;;  %p4373_p1 = scmp.lt.s32.totalorder %s4367_s0, %s4367_s0 }
  0x74   :  { %p4374_p2 = por %p4373_p1, %p4372_p0 }
  0x76   :  { %p4375_p3 = pnand %p4374_p2, %p4368_p13 }
  0x78   :  { %4378 = shalt.err (!%p4375_p3)
}
  0x79   :  { %172 = dma.hbm_to_vmem [thread:$0]  %s4788_s6, 1024, %s4878_s2, [#allocation14], %s4694_s14, %s4694_s14, %s4695_s11  }
  0x7a   :  { %s4696_s24 = smov [#allocation16]   ;;  %s4697_s18 = smov [#allocation19]  }
  0x7b   :  { %s188_s16 = sshll.u32 %s4696_s24, 4  ;;  %s210_s22 = sshll.u32 %s4697_s18, 4  ;;  %s189_s16 = int_to_ptr.vmem [resolvable:$true] %s188_s16  ;;  %s4899_s22 = int_to_ptr.vmem [resolvable:$true] %s210_s22 }
  0x7c   :  { %s4379_s23 = scalar_lea.hbm %s4798_s20, 1024 }
  0x7d   :  { %p4380_p4 = scmp.ne.s32.totalorder %s4798_s20, %s4379_s23  ;;  %p4383_p5 = scmp.lt.u32.totalorder %s4379_s23, %s4798_s20 }
  0x7f   :  { %p4385_p6 = pnand %p4383_p5, %p4380_p4 }
  0x81   :  { %4388 = shalt.err (!%p4385_p6)
}
  0x82   :  { %s4389_s26 = scalar_lea.vmem %s189_s16, 1024  ;;  %p4394_p8 = scmp.lt.s32.totalorder %s189_s16, %s189_s16 }
  0x83   :  { %p4390_p7 = scmp.ne.s32.totalorder %s189_s16, %s4389_s26  ;;  %p4395_p9 = scmp.lt.s32.totalorder %s4389_s26, %s4389_s26 }
  0x85   :  { %p4396_p10 = por %p4395_p9, %p4394_p8 }
  0x87   :  { %p4397_p11 = pnand %p4396_p10, %p4390_p7 }
  0x89   :  { %4400 = shalt.err (!%p4397_p11)
}
  0x8a   :  { %194 = dma.hbm_to_vmem [thread:$0]  %s4798_s20, 1024, %s189_s16, [#allocation17], %s4694_s14, %s4694_s14, %s4695_s11  }
  0x8b   :  { %s4401_s6 = scalar_lea.hbm %s4808_s4, 2048 }
  0x8c   :  { %p4402_p12 = scmp.ne.s32.totalorder %s4808_s4, %s4401_s6  ;;  %p4405_p13 = scmp.lt.u32.totalorder %s4401_s6, %s4808_s4 }
  0x8e   :  { %p4407_p0 = pnand %p4405_p13, %p4402_p12 }
  0x90   :  { %4410 = shalt.err (!%p4407_p0)
}
  0x91   :  { %s4411_s28 = scalar_lea.vmem %s4899_s22, 2048  ;;  %p4416_p2 = scmp.lt.s32.totalorder %s4899_s22, %s4899_s22 }
  0x92   :  { %p4412_p1 = scmp.ne.s32.totalorder %s4899_s22, %s4411_s28  ;;  %p4417_p3 = scmp.lt.s32.totalorder %s4411_s28, %s4411_s28 }
  0x94   :  { %p4418_p4 = por %p4417_p3, %p4416_p2 }
  0x96   :  { %p4419_p5 = pnand %p4418_p4, %p4412_p1 }
  0x98   :  { %4422 = shalt.err (!%p4419_p5)
}
  0x99   :  { %s4698_s29 = smov 128   ;;  %s4699_s20 = smov 8  }
  0x9a   :  { %216 = dma.hbm_to_vmem [thread:$0]  %s4808_s4, 2048, %s4899_s22, [#allocation20], %s4698_s29, %s4698_s29, %s4699_s20  }
  0x9b   :  { %s4700_s1 = smov [#allocation22]   ;;  %s4701_s7 = smov [#allocation2]  }
  0x9c   :  { %s233_s2 = sshll.u32 %s4700_s1, 4  ;;  %s88_s10 = sshll.u32 %s4701_s7, 4  ;;  %s234_s2 = int_to_ptr.vmem [resolvable:$true] %s233_s2  ;;  %s4917_s10 = int_to_ptr.vmem [resolvable:$true] %s88_s10 }
  0x9d   :  { %s4423_s15 = scalar_lea.hbm %s4818_s17, 64 }
  0x9e   :  { %p4424_p6 = scmp.ne.s32.totalorder %s4818_s17, %s4423_s15  ;;  %p4427_p7 = scmp.lt.u32.totalorder %s4423_s15, %s4818_s17 }
  0xa0   :  { %p4429_p8 = pnand %p4427_p7, %p4424_p6 }
  0xa2   :  { %4432 = shalt.err (!%p4429_p8)
}
  0xa3   :  { %s4433_s0 = scalar_lea.vmem %s234_s2, 64  ;;  %p4438_p10 = scmp.lt.s32.totalorder %s234_s2, %s234_s2 }
  0xa4   :  { %p4434_p9 = scmp.ne.s32.totalorder %s234_s2, %s4433_s0  ;;  %p4439_p11 = scmp.lt.s32.totalorder %s4433_s0, %s4433_s0 }
  0xa6   :  { %p4440_p12 = por %p4439_p11, %p4438_p10 }
  0xa8   :  { %p4441_p13 = pnand %p4440_p12, %p4434_p9 }
  0xaa   :  { %4444 = shalt.err (!%p4441_p13)
}
  0xab   :  { %236 = dma.hbm_to_vmem [thread:$0]  %s4818_s17, 64, %s234_s2, [#allocation23]  }
  0xac   :  { %s4445_s4 = scalar_lea.hbm %s4748_s25, 4096 }
  0xad   :  { %p4446_p0 = scmp.ne.s32.totalorder %s4748_s25, %s4445_s4  ;;  %p4449_p1 = scmp.lt.u32.totalorder %s4445_s4, %s4748_s25 }
  0xaf   :  { %p4451_p2 = pnand %p4449_p1, %p4446_p0 }
  0xb1   :  { %4454 = shalt.err (!%p4451_p2)
}
  0xb2   :  { %s4455_s24 = scalar_lea.vmem %s4917_s10, 4096  ;;  %p4460_p4 = scmp.lt.s32.totalorder %s4917_s10, %s4917_s10 }
  0xb3   :  { %p4456_p3 = scmp.ne.s32.totalorder %s4917_s10, %s4455_s24  ;;  %p4461_p5 = scmp.lt.s32.totalorder %s4455_s24, %s4455_s24 }
  0xb5   :  { %p4462_p6 = por %p4461_p5, %p4460_p4 }
  0xb7   :  { %p4463_p7 = pnand %p4462_p6, %p4456_p3 }
  0xb9   :  { %4466 = shalt.err (!%p4463_p7)
}
  0xba   :  { %94 = dma.hbm_to_vmem [thread:$0]  %s4748_s25, 4096, %s4917_s10, [#allocation3], %s4694_s14, %s4694_s14, %s4695_s11  }
  0xbb   :  { %s4702_s17 = smov [#allocation6]   ;;  %s4703_s18 = smov [#allocation9]  }
  0xbc   :  { %s112_s16 = sshll.u32 %s4702_s17, 4  ;;  %s135_s22 = sshll.u32 %s4703_s18, 4  ;;  %s113_s16 = int_to_ptr.vmem [resolvable:$true] %s112_s16  ;;  %s136_s22 = int_to_ptr.vmem [resolvable:$true] %s135_s22 }
  0xbd   :  { %s4467_s23 = scalar_lea.hbm %s4763_s8, 4096 }
  0xbe   :  { %p4468_p8 = scmp.ne.s32.totalorder %s4763_s8, %s4467_s23  ;;  %p4471_p9 = scmp.lt.u32.totalorder %s4467_s23, %s4763_s8 }
  0xc0   :  { %p4473_p10 = pnand %p4471_p9, %p4468_p8 }
  0xc2   :  { %4476 = shalt.err (!%p4473_p10)
}
  0xc3   :  { %s4477_s26 = scalar_lea.vmem %s113_s16, 4096  ;;  %p4482_p12 = scmp.lt.s32.totalorder %s113_s16, %s113_s16 }
  0xc4   :  { %p4478_p11 = scmp.ne.s32.totalorder %s113_s16, %s4477_s26  ;;  %p4483_p13 = scmp.lt.s32.totalorder %s4477_s26, %s4477_s26 }
  0xc6   :  { %p4484_p0 = por %p4483_p13, %p4482_p12 }
  0xc8   :  { %p4485_p1 = pnand %p4484_p0, %p4478_p11 }
  0xca   :  { %4488 = shalt.err (!%p4485_p1)
}
  0xcb   :  { %118 = dma.hbm_to_vmem [thread:$0]  %s4763_s8, 4096, %s113_s16, [#allocation5], %s4694_s14, %s4694_s14, %s4695_s11  }
  0xcc   :  { %s4489_s25 = scalar_lea.hbm %s4773_s19, 32 }
  0xcd   :  { %p4490_p2 = scmp.ne.s32.totalorder %s4773_s19, %s4489_s25  ;;  %p4493_p3 = scmp.lt.u32.totalorder %s4489_s25, %s4773_s19 }
  0xcf   :  { %p4495_p4 = pnand %p4493_p3, %p4490_p2 }
  0xd1   :  { %4498 = shalt.err (!%p4495_p4)
}
  0xd2   :  { %s4499_s6 = scalar_lea.vmem %s136_s22, 32  ;;  %p4504_p6 = scmp.lt.s32.totalorder %s136_s22, %s136_s22 }
  0xd3   :  { %p4500_p5 = scmp.ne.s32.totalorder %s136_s22, %s4499_s6  ;;  %p4505_p7 = scmp.lt.s32.totalorder %s4499_s6, %s4499_s6 }
  0xd5   :  { %p4506_p8 = por %p4505_p7, %p4504_p6 }
  0xd7   :  { %p4507_p9 = pnand %p4506_p8, %p4500_p5 }
  0xd9   :  { %4510 = shalt.err (!%p4507_p9)
}
  0xda   :  { %138 = dma.hbm_to_vmem [thread:$0]  %s4773_s19, 32, %s136_s22, [#allocation8]  }
  0xdb   :  { %s4704_s28 = smov [#allocation12]   ;;  %s4705_s8 = smov [#allocation15]  }
  0xdc   :  { %s157_s29 = sshll.u32 %s4704_s28, 4  ;;  %s179_s14 = sshll.u32 %s4705_s8, 4  ;;  %s158_s29 = int_to_ptr.vmem [resolvable:$true] %s157_s29  ;;  %s180_s14 = int_to_ptr.vmem [resolvable:$true] %s179_s14 }
  0xdd   :  { %s4511_s11 = scalar_lea.hbm %s4783_s30, 16 }
  0xde   :  { %p4512_p10 = scmp.ne.s32.totalorder %s4783_s30, %s4511_s11  ;;  %p4515_p11 = scmp.lt.u32.totalorder %s4511_s11, %s4783_s30 }
  0xe0   :  { %p4517_p12 = pnand %p4515_p11, %p4512_p10 }
  0xe2   :  { %4520 = shalt.err (!%p4517_p12)
}
  0xe3   :  { %s4521_s20 = scalar_lea.vmem %s158_s29, 16  ;;  %s4525_s1 = scalar_lea.vmem %s158_s29, 32 }
  0xe4   :  { %p4522_p13 = scmp.ne.s32.totalorder %s158_s29, %s4521_s20  ;;  %p4526_p0 = scmp.lt.s32.totalorder %s158_s29, %s158_s29 }
  0xe5   :  { %p4527_p1 = scmp.lt.s32.totalorder %s4525_s1, %s4521_s20 }
  0xe7   :  { %p4528_p2 = por %p4527_p1, %p4526_p0 }
  0xe9   :  { %p4529_p3 = pnand %p4528_p2, %p4522_p13 }
  0xeb   :  { %4532 = shalt.err (!%p4529_p3)
}
  0xec   :  { %160 = dma.hbm_to_vmem [thread:$0]  %s4783_s30, 16, %s158_s29, [#allocation11]  }
  0xed   :  { %s4533_s19 = scalar_lea.hbm %s4793_s12, 16 }
  0xee   :  { %p4534_p4 = scmp.ne.s32.totalorder %s4793_s12, %s4533_s19  ;;  %p4537_p5 = scmp.lt.u32.totalorder %s4533_s19, %s4793_s12 }
  0xf0   :  { %p4539_p6 = pnand %p4537_p5, %p4534_p4 }
  0xf2   :  { %4542 = shalt.err (!%p4539_p6)
}
  0xf3   :  { %s4543_s2 = scalar_lea.vmem %s180_s14, 16  ;;  %s4547_s7 = scalar_lea.vmem %s180_s14, 32 }
  0xf4   :  { %p4544_p7 = scmp.ne.s32.totalorder %s180_s14, %s4543_s2  ;;  %p4548_p8 = scmp.lt.s32.totalorder %s180_s14, %s180_s14 }
  0xf5   :  { %p4549_p9 = scmp.lt.s32.totalorder %s4547_s7, %s4543_s2 }
  0xf7   :  { %p4550_p10 = por %p4549_p9, %p4548_p8 }
  0xf9   :  { %p4551_p11 = pnand %p4550_p10, %p4544_p7 }
  0xfb   :  { %4554 = shalt.err (!%p4551_p11)
}
  0xfc   :  { %182 = dma.hbm_to_vmem [thread:$0]  %s4793_s12, 16, %s180_s14, [#allocation14]  }
  0xfd   :  { %s4706_s10 = smov [#allocation18]   ;;  %s4707_s15 = smov [#allocation21]  }
  0xfe   :  { %s201_s30 = sshll.u32 %s4706_s10, 4  ;;  %s223_s0 = sshll.u32 %s4707_s15, 4  ;;  %s202_s30 = int_to_ptr.vmem [resolvable:$true] %s201_s30  ;;  %s224_s0 = int_to_ptr.vmem [resolvable:$true] %s223_s0 }
  0xff   :  { %s4555_s4 = scalar_lea.hbm %s4803_s27, 16 }
 0x100   :  { %p4556_p12 = scmp.ne.s32.totalorder %s4803_s27, %s4555_s4  ;;  %p4559_p13 = scmp.lt.u32.totalorder %s4555_s4, %s4803_s27 }
 0x102   :  { %p4561_p0 = pnand %p4559_p13, %p4556_p12 }
 0x104   :  { %4564 = shalt.err (!%p4561_p0)
}
 0x105   :  { %s4565_s24 = scalar_lea.vmem %s202_s30, 16  ;;  %s4569_s17 = scalar_lea.vmem %s202_s30, 32 }
 0x106   :  { %p4566_p1 = scmp.ne.s32.totalorder %s202_s30, %s4565_s24  ;;  %p4570_p2 = scmp.lt.s32.totalorder %s202_s30, %s202_s30 }
 0x107   :  { %p4571_p3 = scmp.lt.s32.totalorder %s4569_s17, %s4565_s24 }
 0x109   :  { %p4572_p4 = por %p4571_p3, %p4570_p2 }
 0x10b   :  { %p4573_p5 = pnand %p4572_p4, %p4566_p1 }
 0x10d   :  { %4576 = shalt.err (!%p4573_p5)
}
 0x10e   :  { %204 = dma.hbm_to_vmem [thread:$0]  %s4803_s27, 16, %s202_s30, [#allocation17]  }
 0x10f   :  { %s4577_s12 = scalar_lea.hbm %s4813_s3, 32 }
 0x110   :  { %p4578_p6 = scmp.ne.s32.totalorder %s4813_s3, %s4577_s12  ;;  %p4581_p7 = scmp.lt.u32.totalorder %s4577_s12, %s4813_s3 }
 0x112   :  { %p4583_p8 = pnand %p4581_p7, %p4578_p6 }
 0x114   :  { %4586 = shalt.err (!%p4583_p8)
}
 0x115   :  { %s4587_s16 = scalar_lea.vmem %s224_s0, 32  ;;  %p4592_p10 = scmp.lt.s32.totalorder %s224_s0, %s224_s0 }
 0x116   :  { %p4588_p9 = scmp.ne.s32.totalorder %s224_s0, %s4587_s16  ;;  %p4593_p11 = scmp.lt.s32.totalorder %s4587_s16, %s4587_s16 }
 0x118   :  { %p4594_p12 = por %p4593_p11, %p4592_p10 }
 0x11a   :  { %p4595_p13 = pnand %p4594_p12, %p4588_p9 }
 0x11c   :  { %4598 = shalt.err (!%p4595_p13)
}
 0x11d   :  { %s5135_s18 = sld [smem:[#allocation45_spill]]  ;;  %s4708_s22 = smov [#allocation24]  }
 0x11e   :  { %226 = dma.hbm_to_vmem [thread:$0]  %s4813_s3, 32, %s224_s0, [#allocation20]  }
 0x11f   :  { %s248_s23 = sshll.u32 %s4708_s22, 4  ;;  %s249_s23 = int_to_ptr.vmem [resolvable:$true] %s248_s23 }
 0x123   :  { %s4599_s27 = scalar_lea.hbm %s5135_s18, 4096 }
 0x124   :  { %p4600_p0 = scmp.ne.s32.totalorder %s5135_s18, %s4599_s27  ;;  %p4603_p1 = scmp.lt.u32.totalorder %s4599_s27, %s5135_s18 }
 0x126   :  { %p4605_p2 = pnand %p4603_p1, %p4600_p0 }
 0x128   :  { %4608 = shalt.err (!%p4605_p2)
}
 0x129   :  { %s4609_s26 = scalar_lea.vmem %s249_s23, 4096  ;;  %p4614_p4 = scmp.lt.s32.totalorder %s249_s23, %s249_s23 }
 0x12a   :  { %p4610_p3 = scmp.ne.s32.totalorder %s249_s23, %s4609_s26  ;;  %p4615_p5 = scmp.lt.s32.totalorder %s4609_s26, %s4609_s26 }
 0x12c   :  { %p4616_p6 = por %p4615_p5, %p4614_p4 }
 0x12e   :  { %p4617_p7 = pnand %p4616_p6, %p4610_p3 }
 0x130   :  { %4620 = shalt.err (!%p4617_p7)
}
 0x131   :  { %s4709_s25 = smov 256   ;;  %s4710_s3 = smov 16  }
 0x132   :  { %254 = dma.hbm_to_vmem [thread:$0]  %s5135_s18, 4096, %s249_s23, [#allocation23], %s4709_s25, %s4709_s25, %s4710_s3  }
 0x133   :  { %s4711_s6 = smov [#allocation25]   ;;  %s4621_s29 = scalar_lea.hbm %s4853_s9, 4096 }
 0x134   :  { %s264_s28 = sshll.u32 %s4711_s6, 4  ;;  %p4622_p8 = scmp.ne.s32.totalorder %s4853_s9, %s4621_s29  ;;  %s265_s28 = int_to_ptr.vmem [resolvable:$true] %s264_s28 }
 0x135   :  { %p4625_p9 = scmp.lt.u32.totalorder %s4621_s29, %s4853_s9 }
 0x137   :  { %p4627_p10 = pnand %p4625_p9, %p4622_p8 }
 0x139   :  { %4630 = shalt.err (!%p4627_p10)
}
 0x13a   :  { %s4631_s8 = scalar_lea.vmem %s265_s28, 4096  ;;  %p4636_p12 = scmp.lt.s32.totalorder %s265_s28, %s265_s28 }
 0x13b   :  { %p4632_p11 = scmp.ne.s32.totalorder %s265_s28, %s4631_s8  ;;  %p4637_p13 = scmp.lt.s32.totalorder %s4631_s8, %s4631_s8 }
 0x13d   :  { %p4638_p0 = por %p4637_p13, %p4636_p12 }
 0x13f   :  { %p4639_p1 = pnand %p4638_p0, %p4632_p11 }
 0x141   :  { %4642 = shalt.err (!%p4639_p1)
}
 0x142   :  { %270 = dma.hbm_to_vmem [thread:$0]  %s4853_s9, 4096, %s265_s28, [#allocation26], %s4709_s25, %s4709_s25, %s4710_s3  }
 0x143   :  { %4643 = dma.done.wait [#allocation3], 4096  }
 0x144   :  { %4644 = vsyncadd [#allocation3], 4294963200 }
 0x145   :  { %4645 = dma.done.wait [#allocation5], 4112  }
 0x146   :  { %4646 = vsyncadd [#allocation5], 4294963184 }
 0x147   :  { %4647 = dma.done.wait [#allocation8], 48  }
 0x148   :  { %4648 = vsyncadd [#allocation8], 4294967248 }
 0x149   :  { %4649 = dma.done.wait [#allocation11], 2064  }
 0x14a   :  { %4650 = vsyncadd [#allocation11], 4294965232 }
 0x14b   :  { %4651 = dma.done.wait [#allocation14], 1040  }
 0x14c   :  { %4652 = vsyncadd [#allocation14], 4294966256 }
 0x14d   :  { %4653 = dma.done.wait [#allocation17], 1040  }
 0x14e   :  { %4654 = vsyncadd [#allocation17], 4294966256 }
 0x14f   :  { %4655 = dma.done.wait [#allocation20], 2080  }
 0x150   :  { %4656 = vsyncadd [#allocation20], 4294965216 }
 0x151   :  { %4657 = dma.done.wait [#allocation23], 4160  }
 0x152   :  { %4658 = vsyncadd [#allocation23], 4294963136 }
 0x153   :  { %4659 = dma.done.wait [#allocation26], 4096  }
 0x154   :  { %4660 = vsyncadd [#allocation26], 4294963200  ;;  %s5136_s14 = sld [smem:[#allocation36_spill]]  ;;  %s5137_s9 = sld [smem:[#allocation37_spill]]  ;;  %vm368_vm0 = vcmask 261120   ;;  %vm812_vm1 = vcmask 130048  }
 0x155   :  { %s5138_s11 = sld [smem:[#allocation38_spill]]  ;;  %s5139_s20 = sld [smem:[#allocation40_spill]]  ;;  %v4024_v51 = vld [vmem:[#allocation2 + $0x40] sm:$0xff]   ;;  %v4028_v53 = vld [vmem:[#allocation2 + $0x48] sm:$0xff]   ;;  %v4032_v55 = vld [vmem:[#allocation2 + $0x50] sm:$0xff]   ;;  %vm4713_vm2 = vmmov 0  }
 0x156   :  { %v4026_v52 = vld [vmem:[#allocation2] sm:$0xff]   ;;  %v4030_v54 = vld [vmem:[#allocation2 + $0x8] sm:$0xff]   ;;  %v4034_v56 = vld [vmem:[#allocation2 + $0x10] sm:$0xff]   ;;  %s5140_s1 = sld [smem:[#allocation39_spill]]  ;;  %s5141_s19 = sld [smem:[#allocation41_spill]]  ;;  %vm1232_vm3 = vcmask 1043456  }
 0x157   :  { %v4036_v57 = vld [vmem:[#allocation2 + $0x58] sm:$0xff]   ;;  %v4040_v59 = vld [vmem:[#allocation2 + $0x60] sm:$0xff]   ;;  %v4044_v61 = vld [vmem:[#allocation2 + $0x68] sm:$0xff]   ;;  %vm1228_vm4 = vcmask 64512   ;;  %vm1635_vm5 = vcmask 1041408   ;;  %vm1631_vm6 = vcmask 31744  }
 0x158   :  { %v4038_v58 = vld [vmem:[#allocation2 + $0x18] sm:$0xff]   ;;  %v4042_v60 = vld [vmem:[#allocation2 + $0x20] sm:$0xff]   ;;  %v4046_v62 = vld [vmem:[#allocation2 + $0x28] sm:$0xff]   ;;  %s5142_s2 = sld [smem:[#allocation42_spill]]  ;;  %s5143_s7 = sld [smem:[#allocation43_spill]]  ;;  %vm3253_vm7 = vcmask 523264  }
 0x159   :  { %s5144_s10 = sld [smem:[#allocation44_spill]]  ;;  %s5145_s30 = sld [smem:[#allocation46_spill]] }
 0x15a   :  { %v3983_v0 = vld [vmem:[%s5136_s14] sm:$0xff]   ;;  %v3984_v1 = vld [vmem:[%s5136_s14 + $0x8] sm:$0xff]   ;;  %v3987_v4 = vld [vmem:[%s5137_s9 + $0x10] sm:$0xff]   ;;  %s5146_s15 = sld [smem:[#allocation47_spill]] }
 0x15b   :  { %3827 = vmatprep.subr.bf16.mxu0 %v3983_v0  ;;  %v3985_v2 = vld [vmem:[%s5137_s9] sm:$0xff]   ;;  %v3986_v3 = vld [vmem:[%s5137_s9 + $0x8] sm:$0xff]   ;;  %v3993_v9 = vld [vmem:[%s5138_s11 + $0x50] sm:$0xff]  }
 0x15c   :  { %3828 = vmatpush3.bf16.msra.mxu0 %v3983_v0  ;;  %3831 = vmatprep.mubr.msk.bf16.mxu0 %vm368_vm0, %v3985_v2  ;;  %v3989_v5 = vld [vmem:[%s5138_s11 + $0x40] sm:$0xff]   ;;  %v3991_v7 = vld [vmem:[%s5138_s11 + $0x48] sm:$0xff]   ;;  %v3988_v11 = vld [vmem:[%s5137_s9 + $0x18] sm:$0xff]  }
 0x15d   :  { %3829 = vmatprep.subr.bf16.mxu0 %v3984_v1  ;;  %v3990_v6 = vld [vmem:[%s5138_s11] sm:$0xff]   ;;  %3635 = vmatprep.subr.bf16.mxu1 %v3989_v5  ;;  %v3992_v8 = vld [vmem:[%s5138_s11 + $0x8] sm:$0xff]   ;;  %v3995_v12 = vld [vmem:[%s5138_s11 + $0x10] sm:$0xff]  }
 0x15e   :  { %3636 = vmatpush3.bf16.msra.mxu1 %v3990_v6  ;;  %v3994_v10 = vld [vmem:[%s5138_s11 + $0xc0] sm:$0xff]   ;;  %v3997_v14 = vld [vmem:[%s5138_s11 + $0x58] sm:$0xff]   ;;  %v3998_v15 = vld [vmem:[%s5138_s11 + $0xc8] sm:$0xff]  }
 0x15f   :  { %3637 = vmatprep.subr.bf16.mxu1 %v3991_v7  ;;  %v3996_v13 = vld [vmem:[%s5138_s11 + $0x80] sm:$0xff]   ;;  %v3999_v16 = vld [vmem:[%s5138_s11 + $0x18] sm:$0xff]   ;;  %v4000_v17 = vld [vmem:[%s5138_s11 + $0x88] sm:$0xff]  }
 0x160   :  { %3830 = vmatpush3.bf16.msra.mxu0 %v3984_v1  ;;  %v4001_v18 = vld [vmem:[%s5138_s11 + $0x60] sm:$0xff]   ;;  %v4002_v19 = vld [vmem:[%s5138_s11 + $0xd0] sm:$0xff]   ;;  %v4005_v22 = vld [vmem:[%s5138_s11 + $0x68] sm:$0xff]  }
 0x161   :  { %3657 = vmatprep.subr.bf16.mxu0 %v3994_v10  ;;  %v4003_v20 = vld [vmem:[%s5138_s11 + $0x20] sm:$0xff]   ;;  %v4004_v21 = vld [vmem:[%s5138_s11 + $0x90] sm:$0xff]   ;;  %v4006_v23 = vld [vmem:[%s5138_s11 + $0xd8] sm:$0xff]  }
 0x162   :  { %3638 = vmatpush3.bf16.msra.mxu1 %v3992_v8  ;;  %v4007_v24 = vld [vmem:[%s5138_s11 + $0x28] sm:$0xff]   ;;  %v4008_v25 = vld [vmem:[%s5138_s11 + $0x98] sm:$0xff]   ;;  %v4009_v26 = vld [vmem:[%s5138_s11 + $0x70] sm:$0xff]  }
 0x163   :  { %3832 = vmatmul.mubr.msk.bf16.vlgmr.msra.gmra.mrb[0].mxu0 %vm368_vm0, %v3986_v3  ;;  %3639 = vmatprep.subr.bf16.mxu1 %v3993_v9  ;;  %v4010_v27 = vld [vmem:[%s5138_s11 + $0xe0] sm:$0xff]   ;;  %v4011_v28 = vld [vmem:[%s5138_s11 + $0x30] sm:$0xff]   ;;  %v4013_v30 = vld [vmem:[%s5138_s11 + $0x78] sm:$0xff]  }
 0x164   :  { %3835 = vmatprep.mubr.msk.bf16.mxu0 %vm368_vm0, %v3987_v4  ;;  %3658 = vmatpush3.bf16.msra.mxu0 %v3996_v13  ;;  %v4012_v29 = vld [vmem:[%s5138_s11 + $0xa0] sm:$0xff]   ;;  %v4014_v31 = vld [vmem:[%s5138_s11 + $0xe8] sm:$0xff]   ;;  %v4015_v32 = vld [vmem:[%s5138_s11 + $0x38] sm:$0xff]  }
 0x165   :  { %3659 = vmatprep.subr.bf16.mxu0 %v3998_v15  ;;  %v4016_v33 = vld [vmem:[%s5138_s11 + $0xa8] sm:$0xff]   ;;  %v4017_v34 = vld [vmem:[%s5138_s11 + $0xf0] sm:$0xff]   ;;  %v4019_v36 = vld [vmem:[%s5138_s11 + $0xf8] sm:$0xff]  }
 0x166   :  { %3640 = vmatpush3.bf16.msra.mxu1 %v3995_v12  ;;  %v4018_v35 = vld [vmem:[%s5138_s11 + $0xb0] sm:$0xff]   ;;  %v4020_v37 = vld [vmem:[%s5138_s11 + $0xb8] sm:$0xff]   ;;  %v4021_v50 = vld [vmem:[%s5139_s20] sm:$0xff]  }
 0x167   :  { %3641 = vmatprep.subr.bf16.mxu1 %v3997_v14  ;;  %v3365_v5 = vld [vmem:[%s5140_s1] ss:$0 sm:$0xff] }
 0x168   :  { %3660 = vmatpush3.bf16.msra.mxu0 %v4000_v17 }
 0x169   :  { %3661 = vmatprep.subr.bf16.mxu0 %v4002_v19  ;;  %v4023_v19 = vld [vmem:[#allocation2 + $0xc0] sm:$0xff]  }
 0x16a   :  { %3642 = vmatpush3.bf16.msra.mxu1 %v3999_v16 }
 0x16b   :  { %3836 = vmatmul.mubr.msk.bf16.gmra.mrb[4].mxu0 %vm368_vm0, %v3988_v11  ;;  %3643 = vmatprep.subr.bf16.mxu1 %v4001_v18 }
 0x16c   :  { %3662 = vmatpush3.bf16.msra.mxu0 %v4004_v21  ;;  %v4025_v21 = vld [vmem:[#allocation2 + $0x80] sm:$0xff]  }
 0x16d   :  { %3663 = vmatprep.subr.bf16.mxu0 %v4006_v23  ;;  %v4029_v23 = vld [vmem:[#allocation2 + $0x88] sm:$0xff]  }
 0x16e   :  { %3644 = vmatpush3.bf16.msra.mxu1 %v4003_v20  ;;  %v4022_v20 = vld [vmem:[%s5139_s20 + $0x8] sm:$0xff]  }
 0x16f   :  { %3645 = vmatprep.subr.bf16.mxu1 %v4005_v22  ;;  %v4027_v22 = vld [vmem:[#allocation2 + $0xc8] sm:$0xff]  }
 0x170   :  { %3664 = vmatpush3.bf16.msra.mxu0 %v4008_v25  ;;  %v4033_v25 = vld [vmem:[#allocation2 + $0x90] sm:$0xff]  }
 0x171   :  { %3665 = vmatprep.subr.bf16.mxu0 %v4010_v27  ;;  %v4037_v27 = vld [vmem:[#allocation2 + $0x98] sm:$0xff]  }
 0x172   :  { %3646 = vmatpush3.bf16.msra.mxu1 %v4007_v24  ;;  %v4031_v24 = vld [vmem:[#allocation2 + $0xd0] sm:$0xff]  }
 0x173   :  { %3647 = vmatprep.subr.bf16.mxu1 %v4009_v26  ;;  %v4035_v26 = vld [vmem:[#allocation2 + $0xd8] sm:$0xff]  }
 0x174   :  { %3666 = vmatpush3.bf16.msra.mxu0 %v4012_v29  ;;  %v4041_v29 = vld [vmem:[#allocation2 + $0xa0] sm:$0xff]  }
 0x175   :  { %3667 = vmatprep.subr.bf16.mxu0 %v4014_v31  ;;  %v4045_v31 = vld [vmem:[#allocation2 + $0xa8] sm:$0xff]  }
 0x176   :  { %3648 = vmatpush3.bf16.msra.mxu1 %v4011_v28  ;;  %v4039_v28 = vld [vmem:[#allocation2 + $0xe0] sm:$0xff]  }
 0x177   :  { %3649 = vmatprep.subr.bf16.mxu1 %v4013_v30  ;;  %v4043_v30 = vld [vmem:[#allocation2 + $0xe8] sm:$0xff]  }
 0x178   :  { %3668 = vmatpush3.bf16.msra.mxu0 %v4016_v33  ;;  %v4048_v33 = vld [vmem:[#allocation2 + $0x70] sm:$0xff]  }
 0x179   :  { %3669 = vmatprep.subr.bf16.mxu0 %v4017_v34  ;;  %v4049_v34 = vld [vmem:[#allocation2 + $0xb0] sm:$0xff]  }
 0x17a   :  { %3650 = vmatpush3.bf16.msra.mxu1 %v4015_v32  ;;  %v4047_v32 = vld [vmem:[#allocation2 + $0xf0] sm:$0xff]  }
 0x17c   :  { %3670 = vmatpush3.bf16.msra.mxu0 %v4018_v35  ;;  %v4050_v35 = vld [vmem:[#allocation2 + $0x30] sm:$0xff]  }
 0x17d   :  { %3671 = vmatprep.subr.bf16.mxu0 %v4019_v36  ;;  %v4051_v36 = vld [vmem:[#allocation2 + $0xf8] sm:$0xff]  }
 0x180   :  { %3672 = vmatpush3.bf16.msra.mxu0 %v4020_v37  ;;  %v4052_v37 = vld [vmem:[#allocation2 + $0x78] sm:$0xff]  }
 0x181   :  { %3682 = vmatprep.subr.bf16.mxu0 %v4024_v51  ;;  %v4060_v51 = vld [vmem:[#allocation6 + $0x48] sm:$0xff]  }
 0x236   :  { %v3833_v38 = vpop.f32.mrb[0].mxu0 }
 0x237   :  { %v415_v39 = vpop.f32.mrb[1].mxu0 }
 0x238   :  { %v3834_v40 = vpop.f32.mrb[2].mxu0 }
 0x239   :  { %v418_v41 = vpop.f32.mrb[3].mxu0  ;;  %v447_v42 = vpack.c.bf16 %v3834_v40, %v3833_v38  ;;  %v4053_v38 = vld [vmem:[#allocation2 + $0xb8] sm:$0xff]  }
 0x23a   :  { %v446_v43 = vpack.c.bf16 %v418_v41, %v415_v39  ;;  %v4054_v39 = vld [vmem:[#allocation2 + $0x38] sm:$0xff]  }
 0x23b   :  { %745 = vmatprep.mubr.bf16.mxu1 %v447_v42 }
 0x23c   :  { %746 = vmatmul.mubr.bf16.vlgmr.msra.gmra.mrb[0].mxu1 %v446_v43 }
 0x23d   :  { %3841 = vmatprep.mubr.msk.bf16.mxu1 %vm812_vm1, %v4021_v50  ;;  %v4058_v50 = vld [vmem:[#allocation6] sm:$0xff]  }
 0x23e   :  { %v3837_v44 = vpop.f32.mrb[4].mxu0 }
 0x23f   :  { %v431_v45 = vpop.f32.mrb[5].mxu0 }
 0x240   :  { %v3838_v46 = vpop.f32.mrb[6].mxu0 }
 0x241   :  { %v449_v47 = vpack.c.bf16 %v3838_v46, %v3837_v44  ;;  %v434_v48 = vpop.f32.mrb[7].mxu0 }
 0x242   :  { %v448_v49 = vpack.c.bf16 %v434_v48, %v431_v45  ;;  %v4712_v48 = vmov 0.0  }
 0x243   :  { %786 = vmatprep.mubr.bf16.mxu0 %v449_v47 }
 0x244   :  { %787 = vmatmul.mubr.bf16.vlgmr.msra.gmra.mrb[8].mxu0 %v448_v49  ;;  %v4056_v49 = vld [vmem:[#allocation6 + $0x40] sm:$0xff]  }
 0x245   :  { %3683 = vmatpush3.bf16.msra.mxu0 %v4026_v52  ;;  %v4062_v52 = vld [vmem:[#allocation6 + $0x8] sm:$0xff]  }
 0x246   :  { %3684 = vmatprep.subr.bf16.mxu0 %v4028_v53  ;;  %v4064_v53 = vld [vmem:[#allocation6 + $0x50] sm:$0xff]  }
 0x249   :  { %3685 = vmatpush3.bf16.msra.mxu0 %v4030_v54  ;;  %v4066_v54 = vld [vmem:[#allocation6 + $0x10] sm:$0xff]  }
 0x24a   :  { %3686 = vmatprep.subr.bf16.mxu0 %v4032_v55  ;;  %v4068_v55 = vld [vmem:[#allocation6 + $0x58] sm:$0xff]  }
 0x24d   :  { %3687 = vmatpush3.bf16.msra.mxu0 %v4034_v56  ;;  %v4070_v56 = vld [vmem:[#allocation6 + $0x18] sm:$0xff]  }
 0x24e   :  { %3688 = vmatprep.subr.bf16.mxu0 %v4036_v57  ;;  %v4072_v57 = vld [vmem:[#allocation6 + $0x60] sm:$0xff]  }
 0x251   :  { %3689 = vmatpush3.bf16.msra.mxu0 %v4038_v58  ;;  %v4074_v58 = vld [vmem:[#allocation6 + $0x20] sm:$0xff]  }
 0x252   :  { %3690 = vmatprep.subr.bf16.mxu0 %v4040_v59  ;;  %v4076_v59 = vld [vmem:[#allocation6 + $0x68] sm:$0xff]  }
 0x255   :  { %3691 = vmatpush3.bf16.msra.mxu0 %v4042_v60  ;;  %v4078_v60 = vld [vmem:[#allocation6 + $0x28] sm:$0xff]  }
 0x256   :  { %3692 = vmatprep.subr.bf16.mxu0 %v4044_v61 }
 0x259   :  { %3693 = vmatpush3.bf16.msra.mxu0 %v4046_v62 }
 0x25a   :  { %3694 = vmatprep.subr.bf16.mxu0 %v4048_v33  ;;  %v4087_v33 = vld [vmem:[#allocation6 + $0xb8] sm:$0xff]  }
 0x25d   :  { %3695 = vmatpush3.bf16.msra.mxu0 %v4050_v35 }
 0x25e   :  { %3696 = vmatprep.subr.bf16.mxu0 %v4052_v37 }
 0x261   :  { %3697 = vmatpush3.bf16.msra.mxu0 %v4054_v39 }
 0x262   :  { %3845 = vmatprep.subr.bf16.mxu0 %v4712_v48 }
 0x30f   :  { %v3651_v63 = vpop.f32.mrb[0].mxu1 }
 0x310   :  { %v3652_v0 = vpop.f32.mrb[1].mxu1 }
 0x311   :  { %v3653_v1 = vadd.f32 %v3652_v0, %v3651_v63  ;;  %v3654_v2 = vpop.f32.mrb[2].mxu1 }
 0x312   :  { %v3655_v3 = vpop.f32.mrb[3].mxu1 }
 0x313   :  { %v3656_v4 = vadd.f32 %v3655_v3, %v3654_v2  ;;  %v748_v8 = vadd.f32 %v3653_v1, %v3365_v5  ;;  %v3402_v1 = vld [vmem:[#allocation4] ss:$0 sm:$0xff] }
 0x315   :  { %v751_v12 = vadd.f32 %v3656_v4, %v3365_v5 }
 0x317   :  { %v3673_v6 = vpop.f32.mrb[8].mxu0 }
 0x318   :  { %v3674_v7 = vpop.f32.mrb[9].mxu0 }
 0x319   :  { %v3675_v9 = vadd.f32 %v3674_v7, %v3673_v6  ;;  %v3676_v10 = vpop.f32.mrb[10].mxu0 }
 0x31a   :  { %v3677_v11 = vpop.f32.mrb[11].mxu0 }
 0x31b   :  { %v789_v13 = vadd.f32 %v3675_v9, %v748_v8  ;;  %v3678_v14 = vadd.f32 %v3677_v11, %v3676_v10 }
 0x31d   :  { %v792_v15 = vadd.f32 %v3678_v14, %v751_v12  ;;  %v795_v16 = vmax.f32 %v789_v13, 0.0  ;;  %v4057_v12 = vld [vmem:[#allocation6 + $0xc0] sm:$0xff]  }
 0x31e   :  { %v4055_v14 = vld [vmem:[%s5141_s19] sm:$0xff]  }
 0x31f   :  { %v796_v17 = vmax.f32 %v792_v15, 0.0  ;;  %v4059_v15 = vld [vmem:[#allocation6 + $0x80] sm:$0xff]  }
 0x321   :  { %v801_v18 = vpack.c.bf16 %v796_v17, %v795_v16  ;;  %v4061_v16 = vld [vmem:[#allocation6 + $0xc8] sm:$0xff]  }
 0x322   :  { %v4063_v17 = vld [vmem:[#allocation6 + $0x88] sm:$0xff]  }
 0x323   :  { %3839 = vmatprep.subr.bf16.mxu1 %v801_v18 }
 0x324   :  { %3840 = vmatpush3.bf16.msra.mxu1 %v801_v18  ;;  %v4065_v18 = vld [vmem:[#allocation6 + $0xd0] sm:$0xff]  }
 0x325   :  { %3704 = vmatprep.subr.bf16.mxu1 %v4023_v19  ;;  %v4067_v19 = vld [vmem:[#allocation6 + $0x90] sm:$0xff]  }
 0x327   :  { %3842 = vmatmul.mubr.msk.bf16.vlgmr.msra.gmra.mrb[4].mxu1 %vm812_vm1, %v4022_v20  ;;  %v4069_v20 = vld [vmem:[#allocation6 + $0xd8] sm:$0xff]  }
 0x328   :  { %3705 = vmatpush3.bf16.msra.mxu1 %v4025_v21  ;;  %v4071_v21 = vld [vmem:[#allocation6 + $0x98] sm:$0xff]  }
 0x329   :  { %3706 = vmatprep.subr.bf16.mxu1 %v4027_v22  ;;  %v4073_v22 = vld [vmem:[#allocation6 + $0xe0] sm:$0xff]  }
 0x32c   :  { %3707 = vmatpush3.bf16.msra.mxu1 %v4029_v23  ;;  %v4075_v23 = vld [vmem:[#allocation6 + $0xa0] sm:$0xff]  }
 0x32d   :  { %3708 = vmatprep.subr.bf16.mxu1 %v4031_v24  ;;  %v4077_v24 = vld [vmem:[#allocation6 + $0xe8] sm:$0xff]  }
 0x330   :  { %3709 = vmatpush3.bf16.msra.mxu1 %v4033_v25  ;;  %v4079_v25 = vld [vmem:[#allocation6 + $0xa8] sm:$0xff]  }
 0x331   :  { %3710 = vmatprep.subr.bf16.mxu1 %v4035_v26  ;;  %v4080_v26 = vld [vmem:[#allocation6 + $0x70] sm:$0xff]  }
 0x334   :  { %3711 = vmatpush3.bf16.msra.mxu1 %v4037_v27  ;;  %v4081_v27 = vld [vmem:[#allocation6 + $0xf0] sm:$0xff]  }
 0x335   :  { %3712 = vmatprep.subr.bf16.mxu1 %v4039_v28  ;;  %v4082_v28 = vld [vmem:[#allocation6 + $0x30] sm:$0xff]  }
 0x338   :  { %3713 = vmatpush3.bf16.msra.mxu1 %v4041_v29  ;;  %v4083_v29 = vld [vmem:[#allocation6 + $0xb0] sm:$0xff]  }
 0x339   :  { %3714 = vmatprep.subr.bf16.mxu1 %v4043_v30  ;;  %v4084_v30 = vld [vmem:[#allocation6 + $0x78] sm:$0xff]  }
 0x33c   :  { %3715 = vmatpush3.bf16.msra.mxu1 %v4045_v31  ;;  %v4085_v31 = vld [vmem:[#allocation6 + $0xf8] sm:$0xff]  }
 0x33d   :  { %3716 = vmatprep.subr.bf16.mxu1 %v4047_v32  ;;  %v4086_v32 = vld [vmem:[#allocation6 + $0x38] sm:$0xff]  }
 0x340   :  { %3717 = vmatpush3.bf16.msra.mxu1 %v4049_v34 }
 0x341   :  { %3718 = vmatprep.subr.bf16.mxu1 %v4051_v36 }
 0x344   :  { %3719 = vmatpush3.bf16.msra.mxu1 %v4053_v38 }
 0x345   :  { %3728 = vmatprep.subr.bf16.mxu1 %v4056_v49  ;;  %v4094_v49 = vld [vmem:[#allocation10 + $0x58] sm:$0xff]  }
 0x3fa   :  { %v3843_v40 = vpop.f32.mrb[4].mxu1 }
 0x3fb   :  { %v853_v41 = vpop.f32.mrb[5].mxu1 }
 0x3fc   :  { %v3844_v42 = vpop.f32.mrb[6].mxu1 }
 0x3fd   :  { %v869_v43 = vpack.c.bf16 %v3844_v42, %v3843_v40  ;;  %v856_v44 = vpop.f32.mrb[7].mxu1  ;;  %v4088_v42 = vld [vmem:[#allocation10 + $0x40] sm:$0xff]  }
 0x3fe   :  { %v868_v45 = vpack.c.bf16 %v856_v44, %v853_v41  ;;  %v4090_v44 = vld [vmem:[#allocation10 + $0x48] sm:$0xff]  }
 0x3ff   :  { %v874_v46 = vrot.slane %v869_v43, 4 }
 0x400   :  { %v871_v47 = vrot.slane %v868_v45, 4 }
 0x401   :  { %1211 = vmatprep.mubr.bf16.mxu1 %v874_v46  ;;  %v4092_v46 = vld [vmem:[#allocation10 + $0x50] sm:$0xff]  }
 0x402   :  { %1171 = vmatprep.mubr.bf16.mxu0 %v871_v47  ;;  %1212 = vmatmul.mubr.bf16.vlgmr.msra.gmra.mrb[8].mxu1 %v869_v43  ;;  %v4089_v43 = vld [vmem:[#allocation10] sm:$0xff]   ;;  %v4093_v47 = vld [vmem:[#allocation10 + $0x10] sm:$0xff]  }
 0x403   :  { %1172 = vmatmul.mubr.bf16.vlgmr.msra.gmra.mrb[12].mxu0 %v868_v45  ;;  %3729 = vmatpush3.bf16.msra.mxu1 %v4058_v50  ;;  %v4091_v45 = vld [vmem:[#allocation10 + $0x8] sm:$0xff]   ;;  %v4095_v50 = vld [vmem:[#allocation10 + $0x18] sm:$0xff]  }
 0x404   :  { %3847 = vmatprep.mubr.msk.bf16.mxu0 %vm4713_vm2, %v4712_v48  ;;  %3730 = vmatprep.subr.bf16.mxu1 %v4060_v51  ;;  %v4096_v51 = vld [vmem:[#allocation10 + $0x60] sm:$0xff]  }
 0x407   :  { %3731 = vmatpush3.bf16.msra.mxu1 %v4062_v52  ;;  %v4097_v52 = vld [vmem:[#allocation10 + $0x20] sm:$0xff]  }
 0x408   :  { %3732 = vmatprep.subr.bf16.mxu1 %v4064_v53  ;;  %v4098_v53 = vld [vmem:[#allocation10 + $0x68] sm:$0xff]  }
 0x40b   :  { %3733 = vmatpush3.bf16.msra.mxu1 %v4066_v54  ;;  %v4099_v54 = vld [vmem:[#allocation10 + $0x28] sm:$0xff]  }
 0x40c   :  { %3734 = vmatprep.subr.bf16.mxu1 %v4068_v55  ;;  %v4100_v55 = vld [vmem:[#allocation10 + $0x70] sm:$0xff]  }
 0x40f   :  { %3735 = vmatpush3.bf16.msra.mxu1 %v4070_v56  ;;  %v4101_v56 = vld [vmem:[#allocation10 + $0x30] sm:$0xff]  }
 0x410   :  { %3736 = vmatprep.subr.bf16.mxu1 %v4072_v57 }
 0x413   :  { %3737 = vmatpush3.bf16.msra.mxu1 %v4074_v58 }
 0x414   :  { %3738 = vmatprep.subr.bf16.mxu1 %v4076_v59  ;;  %v3437_v59 = vld [vmem:[#allocation7] ss:$0 sm:$0xff] }
 0x417   :  { %3739 = vmatpush3.bf16.msra.mxu1 %v4078_v60 }
 0x418   :  { %3740 = vmatprep.subr.bf16.mxu1 %v4080_v26  ;;  %v4112_v26 = vld [vmem:[#allocation16] sm:$0xff]  }
 0x41b   :  { %3741 = vmatpush3.bf16.msra.mxu1 %v4082_v28  ;;  %v4114_v28 = vld [vmem:[#allocation16 + $0x10] sm:$0xff]  }
 0x41c   :  { %3742 = vmatprep.subr.bf16.mxu1 %v4084_v30  ;;  %v4116_v30 = vld [vmem:[#allocation16 + $0x20] sm:$0xff]  }
 0x41f   :  { %3743 = vmatpush3.bf16.msra.mxu1 %v4086_v32  ;;  %v4118_v32 = vld [vmem:[#allocation16 + $0x30] sm:$0xff]  }
 0x420   :  { %3851 = vmatprep.subr.bf16.mxu1 %v4712_v48 }
 0x4d5   :  { %v3720_v61 = vpop.f32.mrb[8].mxu1 }
 0x4d6   :  { %v3698_v62 = vpop.f32.mrb[12].mxu0  ;;  %v3721_v63 = vpop.f32.mrb[9].mxu1 }
 0x4d7   :  { %v3722_v0 = vadd.f32 %v3721_v63, %v3720_v61  ;;  %v3699_v2 = vpop.f32.mrb[13].mxu0  ;;  %v3723_v3 = vpop.f32.mrb[10].mxu1 }
 0x4d8   :  { %v3700_v4 = vadd.f32 %v3699_v2, %v3698_v62  ;;  %v3701_v5 = vpop.f32.mrb[14].mxu0  ;;  %v3724_v6 = vpop.f32.mrb[11].mxu1 }
 0x4d9   :  { %v3702_v7 = vpop.f32.mrb[15].mxu0 }
 0x4da   :  { %v1174_v8 = vadd.f32 %v3700_v4, %v3402_v1 }
 0x4dc   :  { %v1214_v9 = vadd.f32 %v3722_v0, %v1174_v8 }
 0x4de   :  { %v1219_v10 = vmax.f32 %v1214_v9, 0.0  ;;  %v1629_v9 = vld [vmem:[#allocation9] sm:$0x3] }
 0x4e0   :  { %v1222_v11 = vpack.c.bf16 %v1219_v10, %v1219_v10  ;;  %v4102_v10 = vld [vmem:[#allocation10 + $0x78] sm:$0xff]  }
 0x4e2   :  { %v1234_v13 = vsel %vm1232_vm3, %v1222_v11, 0  ;;  %v4103_v11 = vld [vmem:[#allocation10 + $0x38] sm:$0xff]  }
 0x4e3   :  { %3846 = vmatpush3.bf16.msra.mxu0 %v1234_v13  ;;  %v4105_v13 = vld [vmem:[#allocation13 + $0x8] sm:$0xff]  }
 0x4e4   :  { %3750 = vmatprep.subr.bf16.mxu0 %v4057_v12  ;;  %v4104_v12 = vld [vmem:[#allocation13] sm:$0xff]  }
 0x4e6   :  { %3848 = vmatmul.mubr.msk.bf16.vlgmr.msra.gmra.mrb[16].mxu0 %vm1228_vm4, %v4055_v14  ;;  %v4106_v14 = vld [vmem:[#allocation13 + $0x10] sm:$0xff]  }
 0x4e7   :  { %3751 = vmatpush3.bf16.msra.mxu0 %v4059_v15  ;;  %v4107_v15 = vld [vmem:[#allocation13 + $0x18] sm:$0xff]  }
 0x4e8   :  { %3752 = vmatprep.subr.bf16.mxu0 %v4061_v16  ;;  %v4108_v16 = vld [vmem:[#allocation13 + $0x20] sm:$0xff]  }
 0x4eb   :  { %3753 = vmatpush3.bf16.msra.mxu0 %v4063_v17  ;;  %v4109_v17 = vld [vmem:[#allocation13 + $0x28] sm:$0xff]  }
 0x4ec   :  { %3754 = vmatprep.subr.bf16.mxu0 %v4065_v18 }
 0x4ef   :  { %3755 = vmatpush3.bf16.msra.mxu0 %v4067_v19 }
 0x4f0   :  { %3756 = vmatprep.subr.bf16.mxu0 %v4069_v20 }
 0x4f3   :  { %3757 = vmatpush3.bf16.msra.mxu0 %v4071_v21 }
 0x4f4   :  { %3758 = vmatprep.subr.bf16.mxu0 %v4073_v22 }
 0x4f7   :  { %3759 = vmatpush3.bf16.msra.mxu0 %v4075_v23 }
 0x4f8   :  { %3760 = vmatprep.subr.bf16.mxu0 %v4077_v24  ;;  %v4110_v24 = vld [vmem:[#allocation13 + $0x30] sm:$0xff]  }
 0x4fb   :  { %3761 = vmatpush3.bf16.msra.mxu0 %v4079_v25  ;;  %v4111_v25 = vld [vmem:[#allocation13 + $0x38] sm:$0xff]  }
 0x4fc   :  { %3762 = vmatprep.subr.bf16.mxu0 %v4081_v27  ;;  %v4113_v27 = vld [vmem:[#allocation16 + $0x8] sm:$0xff]  }
 0x4ff   :  { %3763 = vmatpush3.bf16.msra.mxu0 %v4083_v29  ;;  %v4115_v29 = vld [vmem:[#allocation16 + $0x18] sm:$0xff]  }
 0x500   :  { %3764 = vmatprep.subr.bf16.mxu0 %v4085_v31  ;;  %v4117_v31 = vld [vmem:[#allocation16 + $0x28] sm:$0xff]  }
 0x503   :  { %3765 = vmatpush3.bf16.msra.mxu0 %v4087_v33 }
 0x504   :  { %3774 = vmatprep.subr.bf16.mxu0 %v4088_v42  ;;  %v4119_v42 = vld [vmem:[#allocation16 + $0x38] sm:$0xff]  }
 0x5b9   :  { %v1270_v34 = vpop.f32.mrb[16].mxu0 }
 0x5ba   :  { %v3849_v35 = vpop.f32.mrb[17].mxu0 }
 0x5bb   :  { %v1273_v36 = vpop.f32.mrb[18].mxu0 }
 0x5bc   :  { %v1277_v37 = vpack.c.bf16 %v1273_v36, %v1270_v34  ;;  %v3850_v38 = vpop.f32.mrb[19].mxu0  ;;  %v3471_v34 = vld [vmem:[#allocation12] ss:$0 sm:$0xff] }
 0x5be   :  { %v1279_v39 = vrot.slane %v1277_v37, 2  ;;  %v1283_v40 = vrot.slane %v1277_v37, 6  ;;  %v1281_v41 = vrot.slane %v1277_v37, 4 }
 0x5c0   :  { %1580 = vmatprep.mubr.bf16.mxu1 %v1279_v39  ;;  %1620 = vmatprep.mubr.bf16.mxu0 %v1283_v40 }
 0x5c1   :  { %1581 = vmatmul.mubr.bf16.vlgmr.msra.gmra.mrb[12].mxu1 %v1277_v37  ;;  %1621 = vmatmul.mubr.bf16.vlgmr.msra.gmra.mrb[20].mxu0 %v1281_v41 }
 0x5c2   :  { %3853 = vmatprep.mubr.msk.bf16.mxu1 %vm4713_vm2, %v4712_v48  ;;  %3775 = vmatpush3.bf16.msra.mxu0 %v4089_v43  ;;  %v4120_v43 = vld [vmem:[#allocation19] ss:$8 sps:$4 sm:$0xff]  }
 0x5c3   :  { %3776 = vmatprep.subr.bf16.mxu0 %v4090_v44  ;;  %v4122_v44 = vld [vmem:[#allocation19 + $0x4] ss:$8 sps:$4 sm:$0xff]  }
 0x5c6   :  { %3777 = vmatpush3.bf16.msra.mxu0 %v4091_v45  ;;  %v4125_v45 = vld [vmem:[#allocation19 + $0x14] ss:$8 sps:$4 sm:$0xff]  }
 0x5c7   :  { %3778 = vmatprep.subr.bf16.mxu0 %v4092_v46  ;;  %v4123_v46 = vld [vmem:[#allocation19 + $0x10] ss:$8 sps:$4 sm:$0xff]  }
 0x5ca   :  { %3779 = vmatpush3.bf16.msra.mxu0 %v4093_v47  ;;  %v4128_v47 = vld [vmem:[#allocation19 + $0x24] ss:$8 sps:$4 sm:$0xff]  }
 0x5cb   :  { %3780 = vmatprep.subr.bf16.mxu0 %v4094_v49  ;;  %v4126_v49 = vld [vmem:[#allocation19 + $0x20] ss:$8 sps:$4 sm:$0xff]  }
 0x5ce   :  { %3781 = vmatpush3.bf16.msra.mxu0 %v4095_v50  ;;  %v4131_v50 = vld [vmem:[#allocation19 + $0x34] ss:$8 sps:$4 sm:$0xff]  }
 0x5cf   :  { %3782 = vmatprep.subr.bf16.mxu0 %v4096_v51  ;;  %v4129_v51 = vld [vmem:[#allocation19 + $0x30] ss:$8 sps:$4 sm:$0xff]  }
 0x5d2   :  { %3783 = vmatpush3.bf16.msra.mxu0 %v4097_v52  ;;  %v4134_v52 = vld [vmem:[#allocation19 + $0x44] ss:$8 sps:$4 sm:$0xff]  }
 0x5d3   :  { %3784 = vmatprep.subr.bf16.mxu0 %v4098_v53  ;;  %v4132_v53 = vld [vmem:[#allocation19 + $0x40] ss:$8 sps:$4 sm:$0xff]  }
 0x5d6   :  { %3785 = vmatpush3.bf16.msra.mxu0 %v4099_v54  ;;  %v4137_v54 = vld [vmem:[#allocation19 + $0x54] ss:$8 sps:$4 sm:$0xff]  }
 0x5d7   :  { %3786 = vmatprep.subr.bf16.mxu0 %v4100_v55  ;;  %v4135_v55 = vld [vmem:[#allocation19 + $0x50] ss:$8 sps:$4 sm:$0xff]  }
 0x5da   :  { %3787 = vmatpush3.bf16.msra.mxu0 %v4101_v56  ;;  %v4140_v56 = vld [vmem:[#allocation19 + $0x64] ss:$8 sps:$4 sm:$0xff]  }
 0x5db   :  { %3788 = vmatprep.subr.bf16.mxu0 %v4102_v10 }
 0x5de   :  { %3789 = vmatpush3.bf16.msra.mxu0 %v4103_v11 }
 0x5df   :  { %3877 = vmatprep.subr.bf16.mxu0 %v4712_v48 }
 0x694   :  { %v3744_v57 = vpop.f32.mrb[12].mxu1  ;;  %v3766_v58 = vpop.f32.mrb[20].mxu0 }
 0x695   :  { %v3745_v60 = vpop.f32.mrb[13].mxu1  ;;  %v3767_v61 = vpop.f32.mrb[21].mxu0 }
 0x696   :  { %v3746_v62 = vadd.f32 %v3745_v60, %v3744_v57  ;;  %v3768_v63 = vadd.f32 %v3767_v61, %v3766_v58  ;;  %v3747_v0 = vpop.f32.mrb[14].mxu1  ;;  %v3769_v1 = vpop.f32.mrb[22].mxu0  ;;  %v4138_v57 = vld [vmem:[#allocation19 + $0x60] ss:$8 sps:$4 sm:$0xff]   ;;  %v3488_v58 = vld [vmem:[#allocation15] ss:$0 sm:$0xff] }
 0x697   :  { %v3748_v2 = vpop.f32.mrb[15].mxu1  ;;  %v3770_v3 = vpop.f32.mrb[23].mxu0  ;;  %v4143_v1 = vld [vmem:[#allocation19 + $0x74] ss:$8 sps:$4 sm:$0xff]  }
 0x698   :  { %v1583_v4 = vadd.f32 %v3746_v62, %v3437_v59  ;;  %v4141_v2 = vld [vmem:[#allocation19 + $0x70] ss:$8 sps:$4 sm:$0xff]   ;;  %v4714_v3 = vmov 0  }
 0x69a   :  { %v1623_v5 = vadd.f32 %v3768_v63, %v1583_v4  ;;  %v3497_v4 = vld [vmem:[#allocation18] ss:$0 sm:$0xff] }
 0x69c   :  { %v1628_v6 = vmax.f32 %v1623_v5, 0.0 }
 0x69e   :  { %v1630_v7 = vpack.c.bf16 %v1628_v6, %v1628_v6 }
 0x6a0   :  { %v1637_v8 = vsel %vm1635_vm5, %v1630_v7, 0 }
 0x6a1   :  { %3852 = vmatpush3.bf16.msra.mxu1 %v1637_v8 }
 0x6a2   :  { %3857 = vmatprep.subr.bf16.mxu1 %v4712_v48 }
 0x6a4   :  { %3854 = vmatmul.mubr.msk.bf16.vlgmr.msra.gmra.mrb[16].mxu1 %vm1631_vm6, %v1629_v9 }
 0x6a5   :  { %3873 = vmatprep.mubr.msk.bf16.mxu1 %vm4713_vm2, %v4712_v48  ;;  %3858 = vmatpush3.bf16.msra.mxu1 %v4104_v12  ;;  %v4144_v12 = vld [vmem:[%s5142_s2] ss:$16 sps:$4 sm:$0xff]  }
 0x6a6   :  { %3859 = vmatprep.subr.bf16.mxu1 %v4712_v48 }
 0x6a9   :  { %3860 = vmatpush3.bf16.msra.mxu1 %v4105_v13  ;;  %v4146_v13 = vld [vmem:[%s5142_s2 + $0x4] ss:$16 sps:$4 sm:$0xff]  }
 0x6aa   :  { %3861 = vmatprep.subr.bf16.mxu1 %v4712_v48 }
 0x6ad   :  { %3862 = vmatpush3.bf16.msra.mxu1 %v4106_v14  ;;  %v4152_v14 = vld [vmem:[%s5142_s2 + $0x24] ss:$16 sps:$4 sm:$0xff]  }
 0x6ae   :  { %3863 = vmatprep.subr.bf16.mxu1 %v4712_v48 }
 0x6b1   :  { %3864 = vmatpush3.bf16.msra.mxu1 %v4107_v15  ;;  %v4150_v15 = vld [vmem:[%s5142_s2 + $0x20] ss:$16 sps:$4 sm:$0xff]  }
 0x6b2   :  { %3865 = vmatprep.subr.bf16.mxu1 %v4712_v48 }
 0x6b5   :  { %3866 = vmatpush3.bf16.msra.mxu1 %v4108_v16  ;;  %v4158_v16 = vld [vmem:[%s5142_s2 + $0x44] ss:$16 sps:$4 sm:$0xff]  }
 0x6b6   :  { %3867 = vmatprep.subr.bf16.mxu1 %v4712_v48 }
 0x6b9   :  { %3868 = vmatpush3.bf16.msra.mxu1 %v4109_v17  ;;  %v4156_v17 = vld [vmem:[%s5142_s2 + $0x40] ss:$16 sps:$4 sm:$0xff]  }
 0x6ba   :  { %3869 = vmatprep.subr.bf16.mxu1 %v4712_v48 }
 0x6bd   :  { %3870 = vmatpush3.bf16.msra.mxu1 %v4110_v24  ;;  %v4182_v24 = vld [vmem:[%s5142_s2 + $0xc4] ss:$16 sps:$4 sm:$0xff]  }
 0x6be   :  { %3871 = vmatprep.subr.bf16.mxu1 %v4712_v48 }
 0x6c1   :  { %3872 = vmatpush3.bf16.msra.mxu1 %v4111_v25  ;;  %v4180_v25 = vld [vmem:[%s5142_s2 + $0xc0] ss:$16 sps:$4 sm:$0xff]  }
 0x6c2   :  { %2181 = vmatprep.subr.bf16.mxu1 %v4122_v44  ;;  %v4171_v44 = vld [vmem:[%s5142_s2 + $0x88] ss:$16 sps:$4 sm:$0xff]  }
 0x777   :  { %v1673_v18 = vpop.f32.mrb[16].mxu1 }
 0x778   :  { %v1679_v19 = vpack.c.bf16 %v1673_v18, %v1673_v18  ;;  %v3855_v20 = vpop.f32.mrb[17].mxu1  ;;  %v4164_v18 = vld [vmem:[%s5142_s2 + $0x64] ss:$16 sps:$4 sm:$0xff]  }
 0x779   :  { %v1676_v21 = vpop.f32.mrb[18].mxu1  ;;  %v4170_v20 = vld [vmem:[%s5142_s2 + $0x84] ss:$16 sps:$4 sm:$0xff]  }
 0x77a   :  { %v1681_v22 = vrot.slane %v1679_v19, 1  ;;  %v3856_v23 = vpop.f32.mrb[19].mxu1  ;;  %v4168_v21 = vld [vmem:[%s5142_s2 + $0x80] ss:$16 sps:$4 sm:$0xff]  }
 0x77b   :  { %v4174_v23 = vld [vmem:[%s5142_s2 + $0xa0] ss:$16 sps:$4 sm:$0xff]  }
 0x77c   :  { %1850 = vmatprep.mubr.bf16.mxu0 %v1681_v22  ;;  %v4176_v22 = vld [vmem:[%s5142_s2 + $0xa4] ss:$16 sps:$4 sm:$0xff]  }
 0x77d   :  { %1851 = vmatmul.mubr.bf16.vlgmr.msra.gmra.mrb[24].mxu0 %v1679_v19  ;;  %v4162_v19 = vld [vmem:[%s5142_s2 + $0x60] ss:$16 sps:$4 sm:$0xff]  }
 0x77e   :  { %3893 = vmatprep.mubr.msk.bf16.mxu0 %vm4713_vm2, %v4712_v48  ;;  %3878 = vmatpush3.bf16.msra.mxu0 %v4112_v26 }
 0x77f   :  { %3879 = vmatprep.subr.bf16.mxu0 %v4712_v48 }
 0x782   :  { %3880 = vmatpush3.bf16.msra.mxu0 %v4113_v27 }
 0x783   :  { %3881 = vmatprep.subr.bf16.mxu0 %v4712_v48 }
 0x786   :  { %3882 = vmatpush3.bf16.msra.mxu0 %v4114_v28 }
 0x787   :  { %3883 = vmatprep.subr.bf16.mxu0 %v4712_v48 }
 0x78a   :  { %3884 = vmatpush3.bf16.msra.mxu0 %v4115_v29 }
 0x78b   :  { %3885 = vmatprep.subr.bf16.mxu0 %v4712_v48 }
 0x78e   :  { %3886 = vmatpush3.bf16.msra.mxu0 %v4116_v30 }
 0x78f   :  { %3887 = vmatprep.subr.bf16.mxu0 %v4712_v48 }
 0x792   :  { %3888 = vmatpush3.bf16.msra.mxu0 %v4117_v31 }
 0x793   :  { %3889 = vmatprep.subr.bf16.mxu0 %v4712_v48 }
 0x796   :  { %3890 = vmatpush3.bf16.msra.mxu0 %v4118_v32 }
 0x797   :  { %3891 = vmatprep.subr.bf16.mxu0 %v4712_v48 }
 0x79a   :  { %3892 = vmatpush3.bf16.msra.mxu0 %v4119_v42  ;;  %v4165_v42 = vld [vmem:[%s5142_s2 + $0x68] ss:$16 sps:$4 sm:$0xff]  }
 0x79b   :  { %3897 = vmatprep.subr.bf16.mxu0 %v4712_v48 }
 0x850   :  { %v3790_v33 = vpop.f32.mrb[24].mxu0 }
 0x851   :  { %v3791_v35 = vpop.f32.mrb[25].mxu0 }
 0x852   :  { %v3792_v36 = vadd.f32 %v3791_v35, %v3790_v33  ;;  %v3793_v37 = vpop.f32.mrb[26].mxu0  ;;  %v4149_v33 = vld [vmem:[%s5142_s2 + $0xc] ss:$16 sps:$4 sm:$0xff]  }
 0x853   :  { %v3794_v38 = vpop.f32.mrb[27].mxu0  ;;  %v2227_v35 = vld [vmem:[#allocation21] sm:$0x3] }
 0x854   :  { %v1853_v39 = vadd.f32 %v3792_v36, %v3471_v34  ;;  %v4147_v36 = vld [vmem:[%s5142_s2 + $0x8] ss:$16 sps:$4 sm:$0xff]   ;;  %v4155_v37 = vld [vmem:[%s5142_s2 + $0x2c] ss:$16 sps:$4 sm:$0xff]  }
 0x855   :  { %v4153_v38 = vld [vmem:[%s5142_s2 + $0x28] ss:$16 sps:$4 sm:$0xff]  }
 0x856   :  { %v1858_v40 = vmax.f32 %v1853_v39, 0.0  ;;  %v4161_v39 = vld [vmem:[%s5142_s2 + $0x4c] ss:$16 sps:$4 sm:$0xff]  }
 0x858   :  { %v1859_v41 = vpack.c.bf16 %v1858_v40, %v1858_v40  ;;  %v4159_v40 = vld [vmem:[%s5142_s2 + $0x48] ss:$16 sps:$4 sm:$0xff]  }
 0x85a   :  { %3874 = vmatmul.mubr.bf16.vlgmr.msra.gmra.mrb[20].mxu1 %v1859_v41  ;;  %v4167_v41 = vld [vmem:[%s5142_s2 + $0x6c] ss:$16 sps:$4 sm:$0xff]  }
 0x85b   :  { %2182 = vmatpush1.bf16.msra.mxu1 %v4120_v43  ;;  %2213 = vmatprep.mubr.bf16.mxu1 %v4714_v3  ;;  %v4173_v43 = vld [vmem:[%s5142_s2 + $0x8c] ss:$16 sps:$4 sm:$0xff]  }
 0x85c   :  { %2183 = vmatprep.subr.bf16.mxu1 %v4125_v45  ;;  %v4179_v45 = vld [vmem:[%s5142_s2 + $0xac] ss:$16 sps:$4 sm:$0xff]  }
 0x85f   :  { %2184 = vmatpush1.bf16.msra.mxu1 %v4123_v46  ;;  %v4177_v46 = vld [vmem:[%s5142_s2 + $0xa8] ss:$16 sps:$4 sm:$0xff]  }
 0x860   :  { %2185 = vmatprep.subr.bf16.mxu1 %v4128_v47  ;;  %v4185_v47 = vld [vmem:[%s5142_s2 + $0xcc] ss:$16 sps:$4 sm:$0xff]  }
 0x863   :  { %2186 = vmatpush1.bf16.msra.mxu1 %v4126_v49  ;;  %v4183_v49 = vld [vmem:[%s5142_s2 + $0xc8] ss:$16 sps:$4 sm:$0xff]  }
 0x864   :  { %2187 = vmatprep.subr.bf16.mxu1 %v4131_v50  ;;  %v4188_v50 = vld [vmem:[%s5142_s2 + $0xe4] ss:$16 sps:$4 sm:$0xff]  }
 0x867   :  { %2188 = vmatpush1.bf16.msra.mxu1 %v4129_v51  ;;  %v4191_v51 = vld [vmem:[%s5142_s2 + $0xec] ss:$16 sps:$4 sm:$0xff]  }
 0x868   :  { %2189 = vmatprep.subr.bf16.mxu1 %v4134_v52  ;;  %v4186_v52 = vld [vmem:[%s5142_s2 + $0xe0] ss:$16 sps:$4 sm:$0xff]  }
 0x86b   :  { %2190 = vmatpush1.bf16.msra.mxu1 %v4132_v53  ;;  %v4189_v53 = vld [vmem:[%s5142_s2 + $0xe8] ss:$16 sps:$4 sm:$0xff]  }
 0x86c   :  { %2191 = vmatprep.subr.bf16.mxu1 %v4137_v54  ;;  %v2228_v54 = vld [vmem:[#allocation22] sm:$0xf] }
 0x86f   :  { %2192 = vmatpush1.bf16.msra.mxu1 %v4135_v55 }
 0x870   :  { %2193 = vmatprep.subr.bf16.mxu1 %v4140_v56 }
 0x873   :  { %2194 = vmatpush1.bf16.msra.mxu1 %v4138_v57 }
 0x874   :  { %2195 = vmatprep.subr.bf16.mxu1 %v4143_v1  ;;  %v4198_v1 = vld [vmem:[#allocation24 + $0x20] ss:$16 sps:$4 sm:$0xff]  }
 0x877   :  { %2196 = vmatpush1.bf16.msra.mxu1 %v4141_v2  ;;  %v4206_v2 = vld [vmem:[#allocation24 + $0x44] ss:$16 sps:$4 sm:$0xff]  }
 0x878   :  { %2469 = vmatprep.subr.bf16.mxu1 %v4146_v13 }
 0x92d   :  { %v1965_v59 = vpop.f32.mrb[20].mxu1 }
 0x92e   :  { %v1966_v60 = vadd.f32 %v3488_v58, %v1965_v59  ;;  %v3875_v61 = vpop.f32.mrb[21].mxu1 }
 0x92f   :  { %v1968_v62 = vpop.f32.mrb[22].mxu1 }
 0x930   :  { %v1971_v63 = vpack.c.bf16 %v1966_v60, %v1966_v60  ;;  %v3876_v0 = vpop.f32.mrb[23].mxu1  ;;  %v4192_v62 = vld [vmem:[#allocation24] ss:$16 sps:$4 sm:$0xff]  }
 0x931   :  { %v4200_v0 = vld [vmem:[#allocation24 + $0x24] ss:$16 sps:$4 sm:$0xff]  }
 0x932   :  { %3894 = vmatmul.mubr.bf16.vlgmr.msra.gmra.mrb[28].mxu0 %v1971_v63  ;;  %v4194_v63 = vld [vmem:[#allocation24 + $0x4] ss:$16 sps:$4 sm:$0xff]  }
 0x933   :  { %3899 = vmatprep.mubr.msk.bf16.mxu0 %vm4713_vm2, %v4712_v48 }
 0xa05   :  { %v2077_v5 = vpop.f32.mrb[28].mxu0 }
 0xa06   :  { %v2078_v6 = vadd.f32 %v3497_v4, %v2077_v5  ;;  %v3895_v7 = vpop.f32.mrb[29].mxu0  ;;  %v4204_v4 = vld [vmem:[#allocation24 + $0x40] ss:$16 sps:$4 sm:$0xff]   ;;  %v4212_v5 = vld [vmem:[#allocation24 + $0x64] ss:$16 sps:$4 sm:$0xff]  }
 0xa07   :  { %v2080_v8 = vpop.f32.mrb[30].mxu0  ;;  %v4218_v7 = vld [vmem:[#allocation24 + $0x84] ss:$16 sps:$4 sm:$0xff]  }
 0xa08   :  { %v2083_v9 = vmax.f32 %v2078_v6, 0.0  ;;  %v3896_v10 = vpop.f32.mrb[31].mxu0  ;;  %v4210_v6 = vld [vmem:[#allocation24 + $0x60] ss:$16 sps:$4 sm:$0xff]  }
 0xa09   :  { %v4216_v8 = vld [vmem:[#allocation24 + $0x80] ss:$16 sps:$4 sm:$0xff]  }
 0xa0a   :  { %v2084_v11 = vpack.c.bf16 %v2083_v9, %v2083_v9  ;;  %v4224_v9 = vld [vmem:[#allocation24 + $0xa4] ss:$16 sps:$4 sm:$0xff]   ;;  %v4222_v10 = vld [vmem:[#allocation24 + $0xa0] ss:$16 sps:$4 sm:$0xff]  }
 0xa0c   :  { %2214 = vmatmul.mubr.bf16.vlgmr.msra.gmra.mrb[24].mxu1 %v2084_v11  ;;  %v4230_v11 = vld [vmem:[#allocation24 + $0xc4] ss:$16 sps:$4 sm:$0xff]  }
 0xa0d   :  { %2501 = vmatprep.mubr.bf16.mxu1 %v4714_v3  ;;  %2470 = vmatpush1.bf16.msra.mxu1 %v4144_v12  ;;  %v4228_v12 = vld [vmem:[#allocation24 + $0xc0] ss:$16 sps:$4 sm:$0xff]  }
 0xa0e   :  { %2471 = vmatprep.subr.bf16.mxu1 %v4152_v14 }
 0xa11   :  { %2472 = vmatpush1.bf16.msra.mxu1 %v4150_v15 }
 0xa12   :  { %2473 = vmatprep.subr.bf16.mxu1 %v4158_v16 }
 0xa15   :  { %2474 = vmatpush1.bf16.msra.mxu1 %v4156_v17 }
 0xa16   :  { %2475 = vmatprep.subr.bf16.mxu1 %v4164_v18 }
 0xa19   :  { %2476 = vmatpush1.bf16.msra.mxu1 %v4162_v19 }
 0xa1a   :  { %2477 = vmatprep.subr.bf16.mxu1 %v4170_v20 }
 0xa1d   :  { %2478 = vmatpush1.bf16.msra.mxu1 %v4168_v21 }
 0xa1e   :  { %2479 = vmatprep.subr.bf16.mxu1 %v4176_v22 }
 0xa21   :  { %2480 = vmatpush1.bf16.msra.mxu1 %v4174_v23 }
 0xa22   :  { %2481 = vmatprep.subr.bf16.mxu1 %v4182_v24 }
 0xa25   :  { %2482 = vmatpush1.bf16.msra.mxu1 %v4180_v25  ;;  %v4197_v25 = vld [vmem:[#allocation24 + $0xc] ss:$16 sps:$4 sm:$0xff]  }
 0xa26   :  { %2483 = vmatprep.subr.bf16.mxu1 %v4188_v50 }
 0xa29   :  { %2484 = vmatpush1.bf16.msra.mxu1 %v4186_v52 }
 0xa2a   :  { %3903 = vmatprep.subr.bf16.mxu1 %v4712_v48 }
 0xadf   :  { %v2215_v26 = vpop.f32.mrb[24].mxu1 }
 0xae0   :  { %v2217_v27 = vpop.f32.mrb[25].mxu1 }
 0xae1   :  { %v2223_v28 = vrot.slane %v2217_v27, 6  ;;  %v2219_v29 = vpop.f32.mrb[26].mxu1  ;;  %v2560_v27 = vld [vmem:[%s5143_s7] sm:$0xf] }
 0xae2   :  { %v2220_v30 = vpop.f32.mrb[27].mxu1  ;;  %v4203_v29 = vld [vmem:[#allocation24 + $0x2c] ss:$16 sps:$4 sm:$0xff]  }
 0xae3   :  { %v2225_v31 = vsel %vm1635_vm5, %v2215_v26, %v2223_v28  ;;  %v4195_v28 = vld [vmem:[#allocation24 + $0x8] ss:$16 sps:$4 sm:$0xff]  }
 0xae4   :  { %v2226_v32 = vpack.c.bf16 %v2225_v31, %v2225_v31  ;;  %v4201_v30 = vld [vmem:[#allocation24 + $0x28] ss:$16 sps:$4 sm:$0xff]   ;;  %v4209_v31 = vld [vmem:[#allocation24 + $0x4c] ss:$16 sps:$4 sm:$0xff]  }
 0xae6   :  { %v2233_v34 = vsel %vm1635_vm5, %v2226_v32, 0  ;;  %v4207_v32 = vld [vmem:[#allocation24 + $0x48] ss:$16 sps:$4 sm:$0xff]  }
 0xae7   :  { %3898 = vmatpush3.bf16.msra.mxu0 %v2233_v34  ;;  %v4213_v34 = vld [vmem:[#allocation24 + $0x68] ss:$16 sps:$4 sm:$0xff]  }
 0xae8   :  { %2510 = vmatprep.subr.bf16.mxu0 %v4149_v33  ;;  %v4215_v33 = vld [vmem:[#allocation24 + $0x6c] ss:$16 sps:$4 sm:$0xff]  }
 0xaea   :  { %3900 = vmatmul.mubr.msk.bf16.vlgmr.msra.gmra.mrb[32].mxu0 %vm1631_vm6, %v2227_v35  ;;  %v4221_v35 = vld [vmem:[#allocation24 + $0x8c] ss:$16 sps:$4 sm:$0xff]  }
 0xaeb   :  { %2511 = vmatpush1.bf16.msra.mxu0 %v4147_v36  ;;  %2542 = vmatprep.mubr.bf16.mxu0 %v4714_v3  ;;  %v4219_v36 = vld [vmem:[#allocation24 + $0x88] ss:$16 sps:$4 sm:$0xff]  }
 0xaec   :  { %2512 = vmatprep.subr.bf16.mxu0 %v4155_v37  ;;  %v4227_v37 = vld [vmem:[#allocation24 + $0xac] ss:$16 sps:$4 sm:$0xff]  }
 0xaef   :  { %2513 = vmatpush1.bf16.msra.mxu0 %v4153_v38  ;;  %v4225_v38 = vld [vmem:[#allocation24 + $0xa8] ss:$16 sps:$4 sm:$0xff]  }
 0xaf0   :  { %2514 = vmatprep.subr.bf16.mxu0 %v4161_v39  ;;  %v4233_v39 = vld [vmem:[#allocation24 + $0xcc] ss:$16 sps:$4 sm:$0xff]  }
 0xaf3   :  { %2515 = vmatpush1.bf16.msra.mxu0 %v4159_v40  ;;  %v4231_v40 = vld [vmem:[#allocation24 + $0xc8] ss:$16 sps:$4 sm:$0xff]  }
 0xaf4   :  { %2516 = vmatprep.subr.bf16.mxu0 %v4167_v41  ;;  %v4236_v41 = vld [vmem:[#allocation24 + $0xe4] ss:$16 sps:$4 sm:$0xff]  }
 0xaf7   :  { %2517 = vmatpush1.bf16.msra.mxu0 %v4165_v42  ;;  %v4239_v42 = vld [vmem:[#allocation24 + $0xec] ss:$16 sps:$4 sm:$0xff]  }
 0xaf8   :  { %2518 = vmatprep.subr.bf16.mxu0 %v4173_v43  ;;  %v4234_v43 = vld [vmem:[#allocation24 + $0xe0] ss:$16 sps:$4 sm:$0xff]  }
 0xafb   :  { %2519 = vmatpush1.bf16.msra.mxu0 %v4171_v44  ;;  %v4237_v44 = vld [vmem:[#allocation24 + $0xe8] ss:$16 sps:$4 sm:$0xff]  }
 0xafc   :  { %2520 = vmatprep.subr.bf16.mxu0 %v4179_v45  ;;  %v3555_v45 = vld [vmem:[%s5144_s10] ss:$0 sm:$0xff] }
 0xaff   :  { %2521 = vmatpush1.bf16.msra.mxu0 %v4177_v46 }
 0xb00   :  { %2522 = vmatprep.subr.bf16.mxu0 %v4185_v47 }
 0xb03   :  { %2523 = vmatpush1.bf16.msra.mxu0 %v4183_v49 }
 0xb04   :  { %2524 = vmatprep.subr.bf16.mxu0 %v4191_v51 }
 0xb07   :  { %2525 = vmatpush1.bf16.msra.mxu0 %v4189_v53 }
 0xb08   :  { %2805 = vmatprep.subr.bf16.mxu0 %v4194_v63  ;;  %v4265_v63 = vld [vmem:[#allocation25 + $0x80] ss:$16 sps:$4 sm:$0xff]  }
 0xbbd   :  { %v2269_v55 = vpop.f32.mrb[32].mxu0 }
 0xbbe   :  { %v2270_v56 = vadd.f32 %v2269_v55, %v2228_v54  ;;  %v3901_v57 = vpop.f32.mrb[33].mxu0  ;;  %v4241_v54 = vld [vmem:[#allocation25] ss:$16 sps:$4 sm:$0xff]   ;;  %v4243_v55 = vld [vmem:[#allocation25 + $0x4] ss:$16 sps:$4 sm:$0xff]  }
 0xbbf   :  { %v2272_v58 = vpop.f32.mrb[34].mxu0  ;;  %v4247_v57 = vld [vmem:[#allocation25 + $0x20] ss:$16 sps:$4 sm:$0xff]  }
 0xbc0   :  { %v2275_v59 = vmax.f32 %v2270_v56, 0.0  ;;  %v3902_v60 = vpop.f32.mrb[35].mxu0  ;;  %v4249_v56 = vld [vmem:[#allocation25 + $0x24] ss:$16 sps:$4 sm:$0xff]  }
 0xbc1   :  { %v4255_v58 = vld [vmem:[#allocation25 + $0x44] ss:$16 sps:$4 sm:$0xff]  }
 0xbc2   :  { %v2276_v61 = vpack.c.bf16 %v2275_v59, %v2275_v59  ;;  %v4253_v59 = vld [vmem:[#allocation25 + $0x40] ss:$16 sps:$4 sm:$0xff]   ;;  %v4261_v60 = vld [vmem:[#allocation25 + $0x64] ss:$16 sps:$4 sm:$0xff]  }
 0xbc4   :  { %2502 = vmatmul.mubr.bf16.vlgmr.msra.gmra.mrb[28].mxu1 %v2276_v61  ;;  %2543 = vmatmul.mubr.bf16.vlgmr.msra.gmra.mrb[36].mxu0 %v2276_v61  ;;  %v4259_v61 = vld [vmem:[#allocation25 + $0x60] ss:$16 sps:$4 sm:$0xff]  }
 0xbc5   :  { %3905 = vmatprep.mubr.msk.bf16.mxu1 %vm4713_vm2, %v4712_v48  ;;  %2837 = vmatprep.mubr.bf16.mxu0 %v4714_v3 }
 0xbc6   :  { %2806 = vmatpush1.bf16.msra.mxu0 %v4192_v62  ;;  %v4267_v62 = vld [vmem:[#allocation25 + $0x84] ss:$16 sps:$4 sm:$0xff]  }
 0xbc7   :  { %2807 = vmatprep.subr.bf16.mxu0 %v4200_v0  ;;  %v4273_v0 = vld [vmem:[#allocation25 + $0xa4] ss:$16 sps:$4 sm:$0xff]  }
 0xbca   :  { %2808 = vmatpush1.bf16.msra.mxu0 %v4198_v1  ;;  %v4271_v1 = vld [vmem:[#allocation25 + $0xa0] ss:$16 sps:$4 sm:$0xff]  }
 0xbcb   :  { %2809 = vmatprep.subr.bf16.mxu0 %v4206_v2 }
 0xbce   :  { %2810 = vmatpush1.bf16.msra.mxu0 %v4204_v4 }
 0xbcf   :  { %2811 = vmatprep.subr.bf16.mxu0 %v4212_v5 }
 0xbd2   :  { %2812 = vmatpush1.bf16.msra.mxu0 %v4210_v6 }
 0xbd3   :  { %2813 = vmatprep.subr.bf16.mxu0 %v4218_v7 }
 0xbd6   :  { %2814 = vmatpush1.bf16.msra.mxu0 %v4216_v8 }
 0xbd7   :  { %2815 = vmatprep.subr.bf16.mxu0 %v4224_v9 }
 0xbda   :  { %2816 = vmatpush1.bf16.msra.mxu0 %v4222_v10 }
 0xbdb   :  { %2817 = vmatprep.subr.bf16.mxu0 %v4230_v11 }
 0xbde   :  { %2818 = vmatpush1.bf16.msra.mxu0 %v4228_v12 }
 0xbdf   :  { %2819 = vmatprep.subr.bf16.mxu0 %v4236_v41 }
 0xbe2   :  { %2820 = vmatpush1.bf16.msra.mxu0 %v4234_v43 }
 0xbe3   :  { %3909 = vmatprep.subr.bf16.mxu0 %v4712_v48 }
 0xc97   :  { %v2503_v13 = vpop.f32.mrb[28].mxu1  ;;  %v2544_v14 = vpop.f32.mrb[36].mxu0 }
 0xc98   :  { %v2505_v15 = vpop.f32.mrb[29].mxu1  ;;  %v2546_v16 = vpop.f32.mrb[37].mxu0 }
 0xc99   :  { %v2552_v17 = vrot.slane %v2505_v15, 4  ;;  %v2555_v18 = vrot.slane %v2546_v16, 4  ;;  %v2507_v19 = vpop.f32.mrb[30].mxu1  ;;  %v2548_v20 = vpop.f32.mrb[38].mxu0  ;;  %v4244_v15 = vld [vmem:[#allocation25 + $0x8] ss:$16 sps:$4 sm:$0xff]  }
 0xc9a   :  { %v2508_v21 = vpop.f32.mrb[31].mxu1  ;;  %v2549_v22 = vpop.f32.mrb[39].mxu0  ;;  %v4252_v16 = vld [vmem:[#allocation25 + $0x2c] ss:$16 sps:$4 sm:$0xff]   ;;  %v4256_v19 = vld [vmem:[#allocation25 + $0x48] ss:$16 sps:$4 sm:$0xff]  }
 0xc9b   :  { %v2557_v23 = vsel %vm1232_vm3, %v2503_v13, %v2552_v17  ;;  %v2558_v24 = vsel %vm1232_vm3, %v2544_v14, %v2555_v18  ;;  %v4246_v13 = vld [vmem:[#allocation25 + $0xc] ss:$16 sps:$4 sm:$0xff]   ;;  %v4250_v17 = vld [vmem:[#allocation25 + $0x28] ss:$16 sps:$4 sm:$0xff]  }
 0xc9c   :  { %v2559_v26 = vpack.c.bf16 %v2558_v24, %v2557_v23  ;;  %v4240_v14 = vld [vmem:[%s5145_s30] sm:$0xff]   ;;  %v4268_v22 = vld [vmem:[#allocation25 + $0x88] ss:$16 sps:$4 sm:$0xff]  }
 0xc9d   :  { %v4258_v18 = vld [vmem:[#allocation25 + $0x4c] ss:$16 sps:$4 sm:$0xff]   ;;  %v4274_v24 = vld [vmem:[#allocation25 + $0xa8] ss:$16 sps:$4 sm:$0xff]  }
 0xc9e   :  { %3904 = vmatpush3.bf16.msra.mxu1 %v2559_v26  ;;  %v4264_v20 = vld [vmem:[#allocation25 + $0x6c] ss:$16 sps:$4 sm:$0xff]   ;;  %v4277_v26 = vld [vmem:[#allocation25 + $0xc0] ss:$16 sps:$4 sm:$0xff]  }
 0xc9f   :  { %2846 = vmatprep.subr.bf16.mxu1 %v4197_v25  ;;  %v4270_v21 = vld [vmem:[#allocation25 + $0x8c] ss:$16 sps:$4 sm:$0xff]   ;;  %v4279_v25 = vld [vmem:[#allocation25 + $0xc4] ss:$16 sps:$4 sm:$0xff]  }
 0xca0   :  { %v4276_v23 = vld [vmem:[#allocation25 + $0xac] ss:$16 sps:$4 sm:$0xff]  }
 0xca1   :  { %3906 = vmatmul.mubr.msk.bf16.vlgmr.msra.gmra.mrb[32].mxu1 %vm812_vm1, %v2560_v27  ;;  %v4280_v27 = vld [vmem:[#allocation25 + $0xc8] ss:$16 sps:$4 sm:$0xff]  }
 0xca2   :  { %2847 = vmatpush1.bf16.msra.mxu1 %v4195_v28  ;;  %2878 = vmatprep.mubr.bf16.mxu1 %v4714_v3  ;;  %v4285_v28 = vld [vmem:[#allocation25 + $0xe4] ss:$16 sps:$4 sm:$0xff]  }
 0xca3   :  { %2848 = vmatprep.subr.bf16.mxu1 %v4203_v29  ;;  %v4288_v29 = vld [vmem:[#allocation25 + $0xec] ss:$16 sps:$4 sm:$0xff]  }
 0xca6   :  { %2849 = vmatpush1.bf16.msra.mxu1 %v4201_v30  ;;  %v4283_v30 = vld [vmem:[#allocation25 + $0xe0] ss:$16 sps:$4 sm:$0xff]  }
 0xca7   :  { %2850 = vmatprep.subr.bf16.mxu1 %v4209_v31  ;;  %v4286_v31 = vld [vmem:[#allocation25 + $0xe8] ss:$16 sps:$4 sm:$0xff]  }
 0xcaa   :  { %2851 = vmatpush1.bf16.msra.mxu1 %v4207_v32  ;;  %v3589_v32 = vld [vmem:[%s5146_s15] ss:$0 sm:$0xff] }
 0xcab   :  { %2852 = vmatprep.subr.bf16.mxu1 %v4215_v33 }
 0xcae   :  { %2853 = vmatpush1.bf16.msra.mxu1 %v4213_v34 }
 0xcaf   :  { %2854 = vmatprep.subr.bf16.mxu1 %v4221_v35 }
 0xcb2   :  { %2855 = vmatpush1.bf16.msra.mxu1 %v4219_v36 }
 0xcb3   :  { %2856 = vmatprep.subr.bf16.mxu1 %v4227_v37 }
 0xcb6   :  { %2857 = vmatpush1.bf16.msra.mxu1 %v4225_v38 }
 0xcb7   :  { %2858 = vmatprep.subr.bf16.mxu1 %v4233_v39 }
 0xcba   :  { %2859 = vmatpush1.bf16.msra.mxu1 %v4231_v40 }
 0xcbb   :  { %2860 = vmatprep.subr.bf16.mxu1 %v4239_v42  ;;  %v4289_v42 = vld [vmem:[%s4858_s5] sm:$0xff]  }
 0xcbe   :  { %2861 = vmatpush1.bf16.msra.mxu1 %v4237_v44 }
 0xcbf   :  { %3142 = vmatprep.subr.bf16.mxu1 %v4243_v55 }
 0xd74   :  { %v2605_v46 = vpop.f32.mrb[32].mxu1 }
 0xd75   :  { %v2606_v47 = vadd.f32 %v3555_v45, %v2605_v46  ;;  %v3907_v49 = vpop.f32.mrb[33].mxu1 }
 0xd76   :  { %v2608_v50 = vpop.f32.mrb[34].mxu1 }
 0xd77   :  { %v2611_v51 = vmax.f32 %v2606_v47, 0.0  ;;  %v3908_v52 = vpop.f32.mrb[35].mxu1 }
 0xd79   :  { %v2612_v53 = vpack.c.bf16 %v2611_v51, %v2611_v51 }
 0xd7b   :  { %2838 = vmatmul.mubr.bf16.vlgmr.msra.gmra.mrb[40].mxu0 %v2612_v53  ;;  %2879 = vmatmul.mubr.bf16.vlgmr.msra.gmra.mrb[36].mxu1 %v2612_v53 }
 0xd7c   :  { %3913 = vmatprep.mubr.msk.bf16.mxu0 %vm4713_vm2, %v4712_v48  ;;  %3174 = vmatprep.mubr.bf16.mxu1 %v4714_v3 }
 0xd7d   :  { %3143 = vmatpush1.bf16.msra.mxu1 %v4241_v54 }
 0xd7e   :  { %3144 = vmatprep.subr.bf16.mxu1 %v4249_v56  ;;  %v4290_v56 = vld [vmem:[%s4858_s5 + $0x8] sm:$0xff]  }
 0xd81   :  { %3145 = vmatpush1.bf16.msra.mxu1 %v4247_v57  ;;  %v3624_v57 = vld [vmem:[%s4863_s21] ss:$0 sm:$0xff] }
 0xd82   :  { %3146 = vmatprep.subr.bf16.mxu1 %v4255_v58 }
 0xd85   :  { %3147 = vmatpush1.bf16.msra.mxu1 %v4253_v59 }
 0xd86   :  { %3148 = vmatprep.subr.bf16.mxu1 %v4261_v60 }
 0xd89   :  { %3149 = vmatpush1.bf16.msra.mxu1 %v4259_v61 }
 0xd8a   :  { %3150 = vmatprep.subr.bf16.mxu1 %v4267_v62 }
 0xd8d   :  { %3151 = vmatpush1.bf16.msra.mxu1 %v4265_v63 }
 0xd8e   :  { %3152 = vmatprep.subr.bf16.mxu1 %v4273_v0 }
 0xd91   :  { %3153 = vmatpush1.bf16.msra.mxu1 %v4271_v1 }
 0xd92   :  { %3154 = vmatprep.subr.bf16.mxu1 %v4279_v25 }
 0xd95   :  { %3155 = vmatpush1.bf16.msra.mxu1 %v4277_v26 }
 0xd96   :  { %3156 = vmatprep.subr.bf16.mxu1 %v4285_v28 }
 0xd99   :  { %3157 = vmatpush1.bf16.msra.mxu1 %v4283_v30 }
 0xe4e   :  { %v2839_v2 = vpop.f32.mrb[40].mxu0  ;;  %v2880_v4 = vpop.f32.mrb[36].mxu1 }
 0xe4f   :  { %v2841_v5 = vpop.f32.mrb[41].mxu0  ;;  %v2882_v6 = vpop.f32.mrb[37].mxu1 }
 0xe50   :  { %v2887_v7 = vpack.c.bf16 %v2841_v5, %v2839_v2  ;;  %v2888_v8 = vpack.c.bf16 %v2882_v6, %v2880_v4  ;;  %v2843_v9 = vpop.f32.mrb[42].mxu0  ;;  %v2884_v10 = vpop.f32.mrb[38].mxu1 }
 0xe51   :  { %v2844_v11 = vpop.f32.mrb[43].mxu0  ;;  %v2885_v12 = vpop.f32.mrb[39].mxu1 }
 0xe52   :  { %3910 = vmatpush3.bf16.msra.mxu0 %v2887_v7 }
 0xe53   :  { %3911 = vmatprep.subr.bf16.mxu0 %v4712_v48  ;;  %v4262_v48 = vld [vmem:[#allocation25 + $0x68] ss:$16 sps:$4 sm:$0xff]  }
 0xe56   :  { %3912 = vmatpush3.bf16.msra.mxu0 %v2888_v8 }
 0xe57   :  { %3185 = vmatprep.subr.bf16.mxu0 %v4246_v13 }
 0xe59   :  { %3914 = vmatmul.mubr.msk.bf16.vlgmr.msra.gmra.mrb[44].mxu0 %vm368_vm0, %v4240_v14 }
 0xe5a   :  { %3186 = vmatpush1.bf16.msra.mxu0 %v4244_v15  ;;  %3217 = vmatprep.mubr.bf16.mxu0 %v4714_v3  ;;  %v4282_v3 = vld [vmem:[#allocation25 + $0xcc] ss:$16 sps:$4 sm:$0xff]  }
 0xe5b   :  { %3187 = vmatprep.subr.bf16.mxu0 %v4252_v16 }
 0xe5e   :  { %3188 = vmatpush1.bf16.msra.mxu0 %v4250_v17 }
 0xe5f   :  { %3189 = vmatprep.subr.bf16.mxu0 %v4258_v18 }
 0xe62   :  { %3190 = vmatpush1.bf16.msra.mxu0 %v4256_v19 }
 0xe63   :  { %3191 = vmatprep.subr.bf16.mxu0 %v4264_v20 }
 0xe66   :  { %3192 = vmatpush1.bf16.msra.mxu0 %v4262_v48 }
 0xe67   :  { %3193 = vmatprep.subr.bf16.mxu0 %v4270_v21 }
 0xe6a   :  { %3194 = vmatpush1.bf16.msra.mxu0 %v4268_v22 }
 0xe6b   :  { %3195 = vmatprep.subr.bf16.mxu0 %v4276_v23 }
 0xe6e   :  { %3196 = vmatpush1.bf16.msra.mxu0 %v4274_v24 }
 0xe6f   :  { %3197 = vmatprep.subr.bf16.mxu0 %v4282_v3 }
 0xe72   :  { %3198 = vmatpush1.bf16.msra.mxu0 %v4280_v27 }
 0xe73   :  { %3199 = vmatprep.subr.bf16.mxu0 %v4288_v29 }
 0xe76   :  { %3200 = vmatpush1.bf16.msra.mxu0 %v4286_v31 }
 0xf2c   :  { %v2940_v33 = vpop.f32.mrb[44].mxu0 }
 0xf2d   :  { %v2941_v34 = vadd.f32 %v3589_v32, %v2940_v33  ;;  %v3915_v35 = vpop.f32.mrb[45].mxu0 }
 0xf2e   :  { %v2943_v36 = vpop.f32.mrb[46].mxu0 }
 0xf2f   :  { %v2944_v37 = vadd.f32 %v3589_v32, %v2943_v36  ;;  %v3916_v38 = vpop.f32.mrb[47].mxu0  ;;  %v2947_v39 = vmax.f32 %v2941_v34, 0.0 }
 0xf31   :  { %v2948_v40 = vmax.f32 %v2944_v37, 0.0 }
 0xf33   :  { %v2949_v41 = vpack.c.bf16 %v2948_v40, %v2947_v39 }
 0xf35   :  { %3175 = vmatmul.mubr.bf16.vlgmr.msra.gmra.mrb[40].mxu1 %v2949_v41  ;;  %3218 = vmatmul.mubr.bf16.vlgmr.msra.gmra.mrb[48].mxu0 %v2949_v41 }
 0xf36   :  { %3925 = vmatprep.mubr.msk.bf16.mxu1 %vm3253_vm7, %v4289_v42 }
0x1008   :  { %v3176_v43 = vpop.f32.mrb[40].mxu1  ;;  %v3219_v44 = vpop.f32.mrb[48].mxu0 }
0x1009   :  { %v3178_v45 = vpop.f32.mrb[41].mxu1  ;;  %v3221_v46 = vpop.f32.mrb[49].mxu0 }
0x100a   :  { %v3180_v47 = vpop.f32.mrb[42].mxu1  ;;  %v3223_v49 = vpop.f32.mrb[50].mxu0 }
0x100b   :  { %v3228_v50 = vpack.c.bf16 %v3180_v47, %v3176_v43  ;;  %v3230_v51 = vpack.c.bf16 %v3223_v49, %v3219_v44  ;;  %v3182_v52 = vpop.f32.mrb[43].mxu1  ;;  %v3225_v53 = vpop.f32.mrb[51].mxu0 }
0x100c   :  { %v3229_v54 = vpack.c.bf16 %v3182_v52, %v3178_v45  ;;  %v3231_v55 = vpack.c.bf16 %v3225_v53, %v3221_v46 }
0x100d   :  { %3917 = vmatprep.subr.bf16.mxu1 %v3228_v50 }
0x100e   :  { %3918 = vmatpush3.bf16.msra.mxu1 %v3228_v50 }
0x100f   :  { %3919 = vmatprep.subr.bf16.mxu1 %v3229_v54 }
0x1012   :  { %3920 = vmatpush3.bf16.msra.mxu1 %v3229_v54 }
0x1013   :  { %3921 = vmatprep.subr.bf16.mxu1 %v3230_v51 }
0x1016   :  { %3922 = vmatpush3.bf16.msra.mxu1 %v3230_v51 }
0x1017   :  { %3923 = vmatprep.subr.bf16.mxu1 %v3231_v55 }
0x101a   :  { %3924 = vmatpush3.bf16.msra.mxu1 %v3231_v55 }
0x101d   :  { %3926 = vmatmul.mubr.msk.bf16.vlgmr.msra.gmra.mrb[44].mxu1 %vm3253_vm7, %v4290_v56 }
0x10f0   :  { %v3927_v58 = vpop.f32.mrb[44].mxu1 }
0x10f1   :  { %v3303_v59 = vadd.f32 %v3927_v58, %v3624_v57  ;;  %v3294_v60 = vpop.f32.mrb[45].mxu1 }
0x10f2   :  { %v3295_v61 = vadd.f32 %v3624_v57, %v3294_v60  ;;  %v3928_v62 = vpop.f32.mrb[46].mxu1 }
0x10f3   :  { %3311 = vst [vmem:[%s4868_s13 + $0x10] sm:$0xff] %v3303_v59  ;;  %v3306_v63 = vadd.f32 %v3928_v62, %v3624_v57  ;;  %v3297_v0 = vpop.f32.mrb[47].mxu1 }
0x10f4   :  { %3309 = vst [vmem:[%s4868_s13] sm:$0xff] %v3295_v61  ;;  %v3298_v1 = vadd.f32 %v3624_v57, %v3297_v0 }
0x10f5   :  { %3312 = vst [vmem:[%s4868_s13 + $0x18] sm:$0xff] %v3306_v63 }
0x10f6   :  { %3310 = vst [vmem:[%s4868_s13 + $0x8] sm:$0xff] %v3298_v1 }
0x10f7   :  { %3317 = vsyncpa [#allocation3], 1 }
0x10f8   :  { %3318 = vsyncpa [#allocation5], 1 }
0x10f9   :  { %3319 = vsyncpa [#allocation8], 1 }
0x10fa   :  { %3320 = vsyncpa [#allocation11], 1 }
0x10fb   :  { %3321 = vsyncpa [#allocation14], 1 }
0x10fc   :  { %3322 = vsyncpa [#allocation17], 1 }
0x10fd   :  { %3323 = vsyncpa [#allocation20], 1 }
0x10fe   :  { %3324 = vsyncpa [#allocation23], 1 }
0x10ff   :  { %3325 = vsyncpa [#allocation26], 1 }

</bundles_post_ra>
